<compile_context>
chip_gen: v6e
topology: v6e:2x2x1
jax: 0.10.0
libtpu: 0.0.40
codegen_flags: <defaults>
</compile_context>

<pallas_src>
import functools
import math

import jax
import jax.numpy as jnp
from jax.experimental import pallas as pl
from jax.experimental.pallas import tpu as pltpu


# ----------------------------- helpers -------------------------------------

def _recip(x):
    # EUP approx reciprocal (free slot) + one Newton step -> ~f32-exact.
    r = pl.reciprocal(x, approx=True)
    return r * (2.0 - x * r)


def _full_spec(shape):
    n = len(shape)
    return pl.BlockSpec(shape, lambda i: (0,) * n)


# ----------------------------- fused kernel --------------------------------

def _encoder_kernel(x_ref, iw_ref, ib_ref,
                    wqkv_ref, wo_ref,
                    bn1w_ref, bn1b_ref,
                    ffw1_ref, ffb1_ref, ffw2_ref, ffb2_ref,
                    bn2w_ref, bn2b_ref,
                    h_out_ref, ge_out_ref,
                    heads_ref,
                    *, B, N, n_heads, key_dim, n_layers):
    HK = n_heads * key_dim
    norm = 1.0 / math.sqrt(key_dim)

    # ---- init embedding: (B*N, node_dim) @ (node_dim, D) + b ----
    hf = (jnp.dot(x_ref[...], iw_ref[...], preferred_element_type=jnp.float32)
          + ib_ref[...])                                          # (B*N, D)

    for l in range(n_layers):
        # ---------------- MHA + skip connection ----------------
        # single fused QKV projection over all B*N rows
        qkv = jnp.dot(hf, wqkv_ref[l], preferred_element_type=jnp.float32)  # (B*N, 3*HK)
        for b in range(B):
            r0 = b * N
            for hh in range(n_heads):
                c0 = hh * key_dim
                Qh = qkv[r0:r0 + N, c0:c0 + key_dim]
                Kh = qkv[r0:r0 + N, HK + c0:HK + c0 + key_dim]
                Vh = qkv[r0:r0 + N, 2 * HK + c0:2 * HK + c0 + key_dim]
                s = norm * jnp.dot(Qh, Kh.T, preferred_element_type=jnp.float32)
                s = s - jnp.max(s, axis=-1, keepdims=True)
                e = jnp.exp(s)
                attn = e * _recip(jnp.sum(e, axis=-1, keepdims=True))
                # write head output into contiguous (B*N, HK) VMEM buffer
                heads_ref[pl.ds(r0, N), pl.ds(c0, key_dim)] = jnp.dot(
                    attn, Vh, preferred_element_type=jnp.float32)
        # single output projection against full W_out
        mha = jnp.dot(heads_ref[...], wo_ref[l], preferred_element_type=jnp.float32)
        pre1 = hf + mha

        # ---------------- BatchNorm1d (batch stats, affine) ----------------
        mean1 = jnp.mean(pre1, axis=0, keepdims=True)
        cent1 = pre1 - mean1
        var1 = jnp.mean(cent1 * cent1, axis=0, keepdims=True)
        h1 = cent1 * jax.lax.rsqrt(var1 + 1e-5) * bn1w_ref[l] + bn1b_ref[l]

        # ---------------- FeedForward + skip connection ----------------
        hid = jnp.dot(h1, ffw1_ref[l], preferred_element_type=jnp.float32) + ffb1_ref[l]
        hid = jnp.maximum(hid, 0.0)
        y = jnp.dot(hid, ffw2_ref[l], preferred_element_type=jnp.float32) + ffb2_ref[l]
        pre2 = h1 + y

        # ---------------- BatchNorm1d ----------------
        mean2 = jnp.mean(pre2, axis=0, keepdims=True)
        cent2 = pre2 - mean2
        var2 = jnp.mean(cent2 * cent2, axis=0, keepdims=True)
        hf = cent2 * jax.lax.rsqrt(var2 + 1e-5) * bn2w_ref[l] + bn2b_ref[l]

    # ---------------- outputs: h and graph embedding (mean over nodes) ------
    h_out_ref[...] = hf
    inv_n = 1.0 / N
    for b in range(B):
        ge_out_ref[pl.ds(b, 1), :] = inv_n * jnp.sum(
            hf[b * N:(b + 1) * N, :], axis=0, keepdims=True)


# ----------------------------- wrapper --------------------------------------

def graph_attention_encoder(params, x, n_heads, embed_dim, n_layers):
    B, N, node_dim = x.shape
    dk = embed_dim // n_heads
    HK = n_heads * dk
    BN = B * N

    kernel = functools.partial(_encoder_kernel, B=B, N=N, n_heads=n_heads,
                               key_dim=dk, n_layers=n_layers)

    inputs = [
        x.reshape(BN, node_dim),
        params["init_w"], params["init_b"],
        params["wqkv"], params["wo"],
        params["bn1_w"], params["bn1_b"],
        params["ff_w1"], params["ff_b1"], params["ff_w2"], params["ff_b2"],
        params["bn2_w"], params["bn2_b"],
    ]

    h_flat, graph_embedding = pl.pallas_call(
        kernel,
        out_shape=(jax.ShapeDtypeStruct((BN, embed_dim), jnp.float32),
                   jax.ShapeDtypeStruct((B, embed_dim), jnp.float32)),
        grid=(1,),
        in_specs=[_full_spec(a.shape) for a in inputs],
        out_specs=(_full_spec((BN, embed_dim)), _full_spec((B, embed_dim))),
        scratch_shapes=[pltpu.VMEM((BN, HK), jnp.float32)],
        compiler_params=pltpu.CompilerParams(
            dimension_semantics=("arbitrary",)),
    )(*inputs)
    return h_flat.reshape(B, N, embed_dim), graph_embedding


# ----------------------------- parameters -----------------------------------

def init_params(key, n_heads, embed_dim, n_layers, node_dim, ff_hidden):
    dk = embed_dim // n_heads
    HK = n_heads * dk
    keys = iter(jax.random.split(key, 2 + 8 * n_layers))

    def u(shape, stdv):
        return jax.random.uniform(next(keys), shape, jnp.float32, -stdv, stdv)

    params = {}
    s = 1.0 / math.sqrt(node_dim)
    params["init_w"] = u((node_dim, embed_dim), s)          # Linear weight (in, out)
    params["init_b"] = u((1, embed_dim), s)

    wqkv, wo, ffw1, ffb1, ffw2, ffb2 = [], [], [], [], [], []
    for _ in range(n_layers):
        sk = 1.0 / math.sqrt(dk)
        so = 1.0 / math.sqrt(embed_dim)
        Wq = u((n_heads, embed_dim, dk), sk)                # PyTorch per-head layout
        Wk = u((n_heads, embed_dim, dk), sk)
        Wv = u((n_heads, embed_dim, dk), sk)
        Wo = u((n_heads, dk, embed_dim), so)
        # fold per-head stacks -> (D, H*dk); concatenation order matches
        # heads.permute(1,2,0,3).view(-1, H*dk) @ W_out.view(-1, D) in PyTorch
        fold = lambda W: jnp.transpose(W, (1, 0, 2)).reshape(embed_dim, HK)
        wqkv.append(jnp.concatenate([fold(Wq), fold(Wk), fold(Wv)], axis=1))
        wo.append(Wo.reshape(HK, embed_dim))
        s1 = 1.0 / math.sqrt(embed_dim)
        s2 = 1.0 / math.sqrt(ff_hidden)
        ffw1.append(u((embed_dim, ff_hidden), s1))
        ffb1.append(u((1, ff_hidden), s1))
        ffw2.append(u((ff_hidden, embed_dim), s2))
        ffb2.append(u((1, embed_dim), s2))

    params["wqkv"] = jnp.stack(wqkv)                         # (L, D, 3*HK)
    params["wo"] = jnp.stack(wo)                             # (L, HK, D)
    params["ff_w1"] = jnp.stack(ffw1)                        # (L, D, F)
    params["ff_b1"] = jnp.stack(ffb1)                        # (L, 1, F)
    params["ff_w2"] = jnp.stack(ffw2)                        # (L, F, D)
    params["ff_b2"] = jnp.stack(ffb2)                        # (L, 1, D)
    params["bn1_w"] = jnp.ones((n_layers, 1, embed_dim), jnp.float32)
    params["bn1_b"] = jnp.zeros((n_layers, 1, embed_dim), jnp.float32)
    params["bn2_w"] = jnp.ones((n_layers, 1, embed_dim), jnp.float32)
    params["bn2_b"] = jnp.zeros((n_layers, 1, embed_dim), jnp.float32)
    return params


# ----------------------------- main ------------------------------------------

if __name__ == "__main__":
    B, N = 2, 8                  # batch, graph_size
    n_heads, embed_dim = 4, 32
    n_layers = 2
    node_dim = 2                 # 2-D node coordinates (TSP-style)
    ff_hidden = 64

    key = jax.random.PRNGKey(0)
    kx, kp = jax.random.split(key)
    x = jax.random.normal(kx, (B, N, node_dim), jnp.float32)
    params = init_params(kp, n_heads, embed_dim, n_layers, node_dim, ff_hidden)

    h, graph_embedding = graph_attention_encoder(params, x, n_heads, embed_dim, n_layers)
    jax.block_until_ready((h, graph_embedding))
    assert h.shape == (B, N, embed_dim)
    assert graph_embedding.shape == (B, embed_dim)
    # TODO(synk): BatchNorm uses batch statistics (PyTorch train-mode forward);
    # eval-mode running-stats normalization is not modeled.
    print("KERNEL_OK")
</pallas_src>

<mosaic_0001>
module attributes {stable_mosaic.version = 11 : i64} {
  func.func @_encoder_kernel(%arg0: i32, %arg1: memref<16x2xf32, #tpu.memory_space<vmem>>, %arg2: memref<2x32xf32, #tpu.memory_space<vmem>>, %arg3: memref<1x32xf32, #tpu.memory_space<vmem>>, %arg4: memref<2x32x96xf32, #tpu.memory_space<vmem>>, %arg5: memref<2x32x32xf32, #tpu.memory_space<vmem>>, %arg6: memref<2x1x32xf32, #tpu.memory_space<vmem>>, %arg7: memref<2x1x32xf32, #tpu.memory_space<vmem>>, %arg8: memref<2x32x64xf32, #tpu.memory_space<vmem>>, %arg9: memref<2x1x64xf32, #tpu.memory_space<vmem>>, %arg10: memref<2x64x32xf32, #tpu.memory_space<vmem>>, %arg11: memref<2x1x32xf32, #tpu.memory_space<vmem>>, %arg12: memref<2x1x32xf32, #tpu.memory_space<vmem>>, %arg13: memref<2x1x32xf32, #tpu.memory_space<vmem>>, %arg14: memref<16x32xf32, #tpu.memory_space<vmem>>, %arg15: memref<2x32xf32, #tpu.memory_space<vmem>>, %arg16: memref<16x32xf32, #tpu.memory_space<vmem>>) attributes {dimension_semantics = [#tpu.dimension_semantics<arbitrary>], iteration_bounds = array<i64: 1>, scalar_prefetch = 0 : i64, scratch_operands = 1 : i64, tpu.core_type = #tpu.core_type<tc>, window_params = [{pipeline_mode = #tpu.pipeline_mode<synchronous>, transform_indices = @transform_0, window_bounds = array<i64: 16, 2>}, {pipeline_mode = #tpu.pipeline_mode<synchronous>, transform_indices = @transform_1, window_bounds = array<i64: 2, 32>}, {pipeline_mode = #tpu.pipeline_mode<synchronous>, transform_indices = @transform_2, window_bounds = array<i64: 1, 32>}, {pipeline_mode = #tpu.pipeline_mode<synchronous>, transform_indices = @transform_3, window_bounds = array<i64: 2, 32, 96>}, {pipeline_mode = #tpu.pipeline_mode<synchronous>, transform_indices = @transform_4, window_bounds = array<i64: 2, 32, 32>}, {pipeline_mode = #tpu.pipeline_mode<synchronous>, transform_indices = @transform_5, window_bounds = array<i64: 2, 1, 32>}, {pipeline_mode = #tpu.pipeline_mode<synchronous>, transform_indices = @transform_6, window_bounds = array<i64: 2, 1, 32>}, {pipeline_mode = #tpu.pipeline_mode<synchronous>, transform_indices = @transform_7, window_bounds = array<i64: 2, 32, 64>}, {pipeline_mode = #tpu.pipeline_mode<synchronous>, transform_indices = @transform_8, window_bounds = array<i64: 2, 1, 64>}, {pipeline_mode = #tpu.pipeline_mode<synchronous>, transform_indices = @transform_9, window_bounds = array<i64: 2, 64, 32>}, {pipeline_mode = #tpu.pipeline_mode<synchronous>, transform_indices = @transform_10, window_bounds = array<i64: 2, 1, 32>}, {pipeline_mode = #tpu.pipeline_mode<synchronous>, transform_indices = @transform_11, window_bounds = array<i64: 2, 1, 32>}, {pipeline_mode = #tpu.pipeline_mode<synchronous>, transform_indices = @transform_12, window_bounds = array<i64: 2, 1, 32>}, {pipeline_mode = #tpu.pipeline_mode<synchronous>, transform_indices = @transform_13, window_bounds = array<i64: 16, 32>}, {pipeline_mode = #tpu.pipeline_mode<synchronous>, transform_indices = @transform_14, window_bounds = array<i64: 2, 32>}]} {
    %c0 = arith.constant 0 : index
    %c0_0 = arith.constant 0 : index
    %0 = vector.load %arg1[%c0, %c0_0] : memref<16x2xf32, #tpu.memory_space<vmem>>, vector<16x2xf32>
    %c0_1 = arith.constant 0 : index
    %c0_2 = arith.constant 0 : index
    %1 = vector.load %arg2[%c0_1, %c0_2] : memref<2x32xf32, #tpu.memory_space<vmem>>, vector<2x32xf32>
    %cst = arith.constant dense<0.000000e+00> : vector<16x32xf32>
    %2 = tpu.matmul %0, %1, %cst {dimension_numbers = #tpu.dot_dimension_numbers<[1], [0], [0], [1], [0, 0, 1, 1], [], []>} : vector<16x2xf32>, vector<2x32xf32>, vector<16x32xf32> -> vector<16x32xf32>
    %c0_3 = arith.constant 0 : index
    %c0_4 = arith.constant 0 : index
    %3 = vector.load %arg3[%c0_3, %c0_4] : memref<1x32xf32, #tpu.memory_space<vmem>>, vector<1x32xf32>
    %4 = vector.broadcast %3 : vector<1x32xf32> to vector<16x32xf32>
    %5 = arith.addf %2, %4 : vector<16x32xf32>
    %c0_5 = arith.constant 0 : index
    %c0_6 = arith.constant 0 : index
    %c0_7 = arith.constant 0 : index
    %6 = vector.load %arg4[%c0_5, %c0_6, %c0_7] : memref<2x32x96xf32, #tpu.memory_space<vmem>>, vector<1x32x96xf32>
    %7 = vector.shape_cast %6 : vector<1x32x96xf32> to vector<32x96xf32>
    %cst_8 = arith.constant dense<0.000000e+00> : vector<16x96xf32>
    %8 = tpu.matmul %5, %7, %cst_8 {dimension_numbers = #tpu.dot_dimension_numbers<[1], [0], [0], [1], [0, 0, 1, 1], [], []>} : vector<16x32xf32>, vector<32x96xf32>, vector<16x96xf32> -> vector<16x96xf32>
    %9 = vector.extract_strided_slice %8 {offsets = [0, 0], sizes = [8, 8], strides = [1, 1]} : vector<16x96xf32> to vector<8x8xf32>
    %10 = vector.extract_strided_slice %8 {offsets = [0, 32], sizes = [8, 8], strides = [1, 1]} : vector<16x96xf32> to vector<8x8xf32>
    %11 = vector.extract_strided_slice %8 {offsets = [0, 64], sizes = [8, 8], strides = [1, 1]} : vector<16x96xf32> to vector<8x8xf32>
    %12 = tpu.transpose %10, [1, 0] : vector<8x8xf32> -> vector<8x8xf32>
    %cst_9 = arith.constant dense<0.000000e+00> : vector<8x8xf32>
    %13 = tpu.matmul %9, %12, %cst_9 {dimension_numbers = #tpu.dot_dimension_numbers<[1], [0], [0], [1], [0, 0, 1, 1], [], []>} : vector<8x8xf32>, vector<8x8xf32>, vector<8x8xf32> -> vector<8x8xf32>
    %cst_10 = arith.constant 0.353553385 : f32
    %14 = vector.broadcast %cst_10 : f32 to vector<8x8xf32>
    %15 = arith.mulf %14, %13 : vector<8x8xf32>
    %cst_11 = arith.constant dense<0xFF800000> : vector<8xf32>
    %16 = vector.multi_reduction <maximumf>, %15, %cst_11 [1] : vector<8x8xf32> to vector<8xf32>
    %17 = vector.shape_cast %16 : vector<8xf32> to vector<8x1xf32>
    %18 = vector.broadcast %17 : vector<8x1xf32> to vector<8x8xf32>
    %19 = arith.subf %15, %18 : vector<8x8xf32>
    %20 = math.exp %19 : vector<8x8xf32>
    %cst_12 = arith.constant dense<0.000000e+00> : vector<8xf32>
    %21 = vector.multi_reduction <add>, %20, %cst_12 [1] : vector<8x8xf32> to vector<8xf32>
    %22 = vector.shape_cast %21 : vector<8xf32> to vector<8x1xf32>
    %23 = tpu.reciprocal %22 {approx = true} : vector<8x1xf32> -> vector<8x1xf32>
    %24 = arith.mulf %22, %23 : vector<8x1xf32>
    %cst_13 = arith.constant 2.000000e+00 : f32
    %25 = vector.broadcast %cst_13 : f32 to vector<8x1xf32>
    %26 = arith.subf %25, %24 : vector<8x1xf32>
    %27 = arith.mulf %23, %26 : vector<8x1xf32>
    %28 = vector.broadcast %27 : vector<8x1xf32> to vector<8x8xf32>
    %29 = arith.mulf %20, %28 : vector<8x8xf32>
    %cst_14 = arith.constant dense<0.000000e+00> : vector<8x8xf32>
    %30 = tpu.matmul %29, %11, %cst_14 {dimension_numbers = #tpu.dot_dimension_numbers<[1], [0], [0], [1], [0, 0, 1, 1], [], []>} : vector<8x8xf32>, vector<8x8xf32>, vector<8x8xf32> -> vector<8x8xf32>
    %c0_15 = arith.constant 0 : index
    %c0_16 = arith.constant 0 : index
    %31 = vector.load %arg16[%c0_15, %c0_16] : memref<16x32xf32, #tpu.memory_space<vmem>>, vector<8x8xf32>
    tpu.vector_store %arg16[%c0_15, %c0_16], %30 {strides = array<i32>} : memref<16x32xf32, #tpu.memory_space<vmem>>, vector<8x8xf32>,
    %32 = vector.extract_strided_slice %8 {offsets = [0, 8], sizes = [8, 8], strides = [1, 1]} : vector<16x96xf32> to vector<8x8xf32>
    %33 = vector.extract_strided_slice %8 {offsets = [0, 40], sizes = [8, 8], strides = [1, 1]} : vector<16x96xf32> to vector<8x8xf32>
    %34 = vector.extract_strided_slice %8 {offsets = [0, 72], sizes = [8, 8], strides = [1, 1]} : vector<16x96xf32> to vector<8x8xf32>
    %35 = tpu.transpose %33, [1, 0] : vector<8x8xf32> -> vector<8x8xf32>
    %cst_17 = arith.constant dense<0.000000e+00> : vector<8x8xf32>
    %36 = tpu.matmul %32, %35, %cst_17 {dimension_numbers = #tpu.dot_dimension_numbers<[1], [0], [0], [1], [0, 0, 1, 1], [], []>} : vector<8x8xf32>, vector<8x8xf32>, vector<8x8xf32> -> vector<8x8xf32>
    %cst_18 = arith.constant 0.353553385 : f32
    %37 = vector.broadcast %cst_18 : f32 to vector<8x8xf32>
    %38 = arith.mulf %37, %36 : vector<8x8xf32>
    %cst_19 = arith.constant dense<0xFF800000> : vector<8xf32>
    %39 = vector.multi_reduction <maximumf>, %38, %cst_19 [1] : vector<8x8xf32> to vector<8xf32>
    %40 = vector.shape_cast %39 : vector<8xf32> to vector<8x1xf32>
    %41 = vector.broadcast %40 : vector<8x1xf32> to vector<8x8xf32>
    %42 = arith.subf %38, %41 : vector<8x8xf32>
    %43 = math.exp %42 : vector<8x8xf32>
    %cst_20 = arith.constant dense<0.000000e+00> : vector<8xf32>
    %44 = vector.multi_reduction <add>, %43, %cst_20 [1] : vector<8x8xf32> to vector<8xf32>
    %45 = vector.shape_cast %44 : vector<8xf32> to vector<8x1xf32>
    %46 = tpu.reciprocal %45 {approx = true} : vector<8x1xf32> -> vector<8x1xf32>
    %47 = arith.mulf %45, %46 : vector<8x1xf32>
    %cst_21 = arith.constant 2.000000e+00 : f32
    %48 = vector.broadcast %cst_21 : f32 to vector<8x1xf32>
    %49 = arith.subf %48, %47 : vector<8x1xf32>
    %50 = arith.mulf %46, %49 : vector<8x1xf32>
    %51 = vector.broadcast %50 : vector<8x1xf32> to vector<8x8xf32>
    %52 = arith.mulf %43, %51 : vector<8x8xf32>
    %cst_22 = arith.constant dense<0.000000e+00> : vector<8x8xf32>
    %53 = tpu.matmul %52, %34, %cst_22 {dimension_numbers = #tpu.dot_dimension_numbers<[1], [0], [0], [1], [0, 0, 1, 1], [], []>} : vector<8x8xf32>, vector<8x8xf32>, vector<8x8xf32> -> vector<8x8xf32>
    %c0_23 = arith.constant 0 : index
    %c8 = arith.constant 8 : index
    %54 = vector.load %arg16[%c0_23, %c8] : memref<16x32xf32, #tpu.memory_space<vmem>>, vector<8x8xf32>
    tpu.vector_store %arg16[%c0_23, %c8], %53 {strides = array<i32>} : memref<16x32xf32, #tpu.memory_space<vmem>>, vector<8x8xf32>,
    %55 = vector.extract_strided_slice %8 {offsets = [0, 16], sizes = [8, 8], strides = [1, 1]} : vector<16x96xf32> to vector<8x8xf32>
    %56 = vector.extract_strided_slice %8 {offsets = [0, 48], sizes = [8, 8], strides = [1, 1]} : vector<16x96xf32> to vector<8x8xf32>
    %57 = vector.extract_strided_slice %8 {offsets = [0, 80], sizes = [8, 8], strides = [1, 1]} : vector<16x96xf32> to vector<8x8xf32>
    %58 = tpu.transpose %56, [1, 0] : vector<8x8xf32> -> vector<8x8xf32>
    %cst_24 = arith.constant dense<0.000000e+00> : vector<8x8xf32>
    %59 = tpu.matmul %55, %58, %cst_24 {dimension_numbers = #tpu.dot_dimension_numbers<[1], [0], [0], [1], [0, 0, 1, 1], [], []>} : vector<8x8xf32>, vector<8x8xf32>, vector<8x8xf32> -> vector<8x8xf32>
    %cst_25 = arith.constant 0.353553385 : f32
    %60 = vector.broadcast %cst_25 : f32 to vector<8x8xf32>
    %61 = arith.mulf %60, %59 : vector<8x8xf32>
    %cst_26 = arith.constant dense<0xFF800000> : vector<8xf32>
    %62 = vector.multi_reduction <maximumf>, %61, %cst_26 [1] : vector<8x8xf32> to vector<8xf32>
    %63 = vector.shape_cast %62 : vector<8xf32> to vector<8x1xf32>
    %64 = vector.broadcast %63 : vector<8x1xf32> to vector<8x8xf32>
    %65 = arith.subf %61, %64 : vector<8x8xf32>
    %66 = math.exp %65 : vector<8x8xf32>
    %cst_27 = arith.constant dense<0.000000e+00> : vector<8xf32>
    %67 = vector.multi_reduction <add>, %66, %cst_27 [1] : vector<8x8xf32> to vector<8xf32>
    %68 = vector.shape_cast %67 : vector<8xf32> to vector<8x1xf32>
    %69 = tpu.reciprocal %68 {approx = true} : vector<8x1xf32> -> vector<8x1xf32>
    %70 = arith.mulf %68, %69 : vector<8x1xf32>
    %cst_28 = arith.constant 2.000000e+00 : f32
    %71 = vector.broadcast %cst_28 : f32 to vector<8x1xf32>
    %72 = arith.subf %71, %70 : vector<8x1xf32>
    %73 = arith.mulf %69, %72 : vector<8x1xf32>
    %74 = vector.broadcast %73 : vector<8x1xf32> to vector<8x8xf32>
    %75 = arith.mulf %66, %74 : vector<8x8xf32>
    %cst_29 = arith.constant dense<0.000000e+00> : vector<8x8xf32>
    %76 = tpu.matmul %75, %57, %cst_29 {dimension_numbers = #tpu.dot_dimension_numbers<[1], [0], [0], [1], [0, 0, 1, 1], [], []>} : vector<8x8xf32>, vector<8x8xf32>, vector<8x8xf32> -> vector<8x8xf32>
    %c0_30 = arith.constant 0 : index
    %c16 = arith.constant 16 : index
    %77 = vector.load %arg16[%c0_30, %c16] : memref<16x32xf32, #tpu.memory_space<vmem>>, vector<8x8xf32>
    tpu.vector_store %arg16[%c0_30, %c16], %76 {strides = array<i32>} : memref<16x32xf32, #tpu.memory_space<vmem>>, vector<8x8xf32>,
    %78 = vector.extract_strided_slice %8 {offsets = [0, 24], sizes = [8, 8], strides = [1, 1]} : vector<16x96xf32> to vector<8x8xf32>
    %79 = vector.extract_strided_slice %8 {offsets = [0, 56], sizes = [8, 8], strides = [1, 1]} : vector<16x96xf32> to vector<8x8xf32>
    %80 = vector.extract_strided_slice %8 {offsets = [0, 88], sizes = [8, 8], strides = [1, 1]} : vector<16x96xf32> to vector<8x8xf32>
    %81 = tpu.transpose %79, [1, 0] : vector<8x8xf32> -> vector<8x8xf32>
    %cst_31 = arith.constant dense<0.000000e+00> : vector<8x8xf32>
    %82 = tpu.matmul %78, %81, %cst_31 {dimension_numbers = #tpu.dot_dimension_numbers<[1], [0], [0], [1], [0, 0, 1, 1], [], []>} : vector<8x8xf32>, vector<8x8xf32>, vector<8x8xf32> -> vector<8x8xf32>
    %cst_32 = arith.constant 0.353553385 : f32
    %83 = vector.broadcast %cst_32 : f32 to vector<8x8xf32>
    %84 = arith.mulf %83, %82 : vector<8x8xf32>
    %cst_33 = arith.constant dense<0xFF800000> : vector<8xf32>
    %85 = vector.multi_reduction <maximumf>, %84, %cst_33 [1] : vector<8x8xf32> to vector<8xf32>
    %86 = vector.shape_cast %85 : vector<8xf32> to vector<8x1xf32>
    %87 = vector.broadcast %86 : vector<8x1xf32> to vector<8x8xf32>
    %88 = arith.subf %84, %87 : vector<8x8xf32>
    %89 = math.exp %88 : vector<8x8xf32>
    %cst_34 = arith.constant dense<0.000000e+00> : vector<8xf32>
    %90 = vector.multi_reduction <add>, %89, %cst_34 [1] : vector<8x8xf32> to vector<8xf32>
    %91 = vector.shape_cast %90 : vector<8xf32> to vector<8x1xf32>
    %92 = tpu.reciprocal %91 {approx = true} : vector<8x1xf32> -> vector<8x1xf32>
    %93 = arith.mulf %91, %92 : vector<8x1xf32>
    %cst_35 = arith.constant 2.000000e+00 : f32
    %94 = vector.broadcast %cst_35 : f32 to vector<8x1xf32>
    %95 = arith.subf %94, %93 : vector<8x1xf32>
    %96 = arith.mulf %92, %95 : vector<8x1xf32>
    %97 = vector.broadcast %96 : vector<8x1xf32> to vector<8x8xf32>
    %98 = arith.mulf %89, %97 : vector<8x8xf32>
    %cst_36 = arith.constant dense<0.000000e+00> : vector<8x8xf32>
    %99 = tpu.matmul %98, %80, %cst_36 {dimension_numbers = #tpu.dot_dimension_numbers<[1], [0], [0], [1], [0, 0, 1, 1], [], []>} : vector<8x8xf32>, vector<8x8xf32>, vector<8x8xf32> -> vector<8x8xf32>
    %c0_37 = arith.constant 0 : index
    %c24 = arith.constant 24 : index
    %100 = vector.load %arg16[%c0_37, %c24] : memref<16x32xf32, #tpu.memory_space<vmem>>, vector<8x8xf32>
    tpu.vector_store %arg16[%c0_37, %c24], %99 {strides = array<i32>} : memref<16x32xf32, #tpu.memory_space<vmem>>, vector<8x8xf32>,
    %101 = vector.extract_strided_slice %8 {offsets = [8, 0], sizes = [8, 8], strides = [1, 1]} : vector<16x96xf32> to vector<8x8xf32>
    %102 = vector.extract_strided_slice %8 {offsets = [8, 32], sizes = [8, 8], strides = [1, 1]} : vector<16x96xf32> to vector<8x8xf32>
    %103 = vector.extract_strided_slice %8 {offsets = [8, 64], sizes = [8, 8], strides = [1, 1]} : vector<16x96xf32> to vector<8x8xf32>
    %104 = tpu.transpose %102, [1, 0] : vector<8x8xf32> -> vector<8x8xf32>
    %cst_38 = arith.constant dense<0.000000e+00> : vector<8x8xf32>
    %105 = tpu.matmul %101, %104, %cst_38 {dimension_numbers = #tpu.dot_dimension_numbers<[1], [0], [0], [1], [0, 0, 1, 1], [], []>} : vector<8x8xf32>, vector<8x8xf32>, vector<8x8xf32> -> vector<8x8xf32>
    %cst_39 = arith.constant 0.353553385 : f32
    %106 = vector.broadcast %cst_39 : f32 to vector<8x8xf32>
    %107 = arith.mulf %106, %105 : vector<8x8xf32>
    %cst_40 = arith.constant dense<0xFF800000> : vector<8xf32>
    %108 = vector.multi_reduction <maximumf>, %107, %cst_40 [1] : vector<8x8xf32> to vector<8xf32>
    %109 = vector.shape_cast %108 : vector<8xf32> to vector<8x1xf32>
    %110 = vector.broadcast %109 : vector<8x1xf32> to vector<8x8xf32>
    %111 = arith.subf %107, %110 : vector<8x8xf32>
    %112 = math.exp %111 : vector<8x8xf32>
    %cst_41 = arith.constant dense<0.000000e+00> : vector<8xf32>
    %113 = vector.multi_reduction <add>, %112, %cst_41 [1] : vector<8x8xf32> to vector<8xf32>
    %114 = vector.shape_cast %113 : vector<8xf32> to vector<8x1xf32>
    %115 = tpu.reciprocal %114 {approx = true} : vector<8x1xf32> -> vector<8x1xf32>
    %116 = arith.mulf %114, %115 : vector<8x1xf32>
    %cst_42 = arith.constant 2.000000e+00 : f32
    %117 = vector.broadcast %cst_42 : f32 to vector<8x1xf32>
    %118 = arith.subf %117, %116 : vector<8x1xf32>
    %119 = arith.mulf %115, %118 : vector<8x1xf32>
    %120 = vector.broadcast %119 : vector<8x1xf32> to vector<8x8xf32>
    %121 = arith.mulf %112, %120 : vector<8x8xf32>
    %cst_43 = arith.constant dense<0.000000e+00> : vector<8x8xf32>
    %122 = tpu.matmul %121, %103, %cst_43 {dimension_numbers = #tpu.dot_dimension_numbers<[1], [0], [0], [1], [0, 0, 1, 1], [], []>} : vector<8x8xf32>, vector<8x8xf32>, vector<8x8xf32> -> vector<8x8xf32>
    %c8_44 = arith.constant 8 : index
    %c0_45 = arith.constant 0 : index
    %123 = vector.load %arg16[%c8_44, %c0_45] : memref<16x32xf32, #tpu.memory_space<vmem>>, vector<8x8xf32>
    tpu.vector_store %arg16[%c8_44, %c0_45], %122 {strides = array<i32>} : memref<16x32xf32, #tpu.memory_space<vmem>>, vector<8x8xf32>,
    %124 = vector.extract_strided_slice %8 {offsets = [8, 8], sizes = [8, 8], strides = [1, 1]} : vector<16x96xf32> to vector<8x8xf32>
    %125 = vector.extract_strided_slice %8 {offsets = [8, 40], sizes = [8, 8], strides = [1, 1]} : vector<16x96xf32> to vector<8x8xf32>
    %126 = vector.extract_strided_slice %8 {offsets = [8, 72], sizes = [8, 8], strides = [1, 1]} : vector<16x96xf32> to vector<8x8xf32>
    %127 = tpu.transpose %125, [1, 0] : vector<8x8xf32> -> vector<8x8xf32>
    %cst_46 = arith.constant dense<0.000000e+00> : vector<8x8xf32>
    %128 = tpu.matmul %124, %127, %cst_46 {dimension_numbers = #tpu.dot_dimension_numbers<[1], [0], [0], [1], [0, 0, 1, 1], [], []>} : vector<8x8xf32>, vector<8x8xf32>, vector<8x8xf32> -> vector<8x8xf32>
    %cst_47 = arith.constant 0.353553385 : f32
    %129 = vector.broadcast %cst_47 : f32 to vector<8x8xf32>
    %130 = arith.mulf %129, %128 : vector<8x8xf32>
    %cst_48 = arith.constant dense<0xFF800000> : vector<8xf32>
    %131 = vector.multi_reduction <maximumf>, %130, %cst_48 [1] : vector<8x8xf32> to vector<8xf32>
    %132 = vector.shape_cast %131 : vector<8xf32> to vector<8x1xf32>
    %133 = vector.broadcast %132 : vector<8x1xf32> to vector<8x8xf32>
    %134 = arith.subf %130, %133 : vector<8x8xf32>
    %135 = math.exp %134 : vector<8x8xf32>
    %cst_49 = arith.constant dense<0.000000e+00> : vector<8xf32>
    %136 = vector.multi_reduction <add>, %135, %cst_49 [1] : vector<8x8xf32> to vector<8xf32>
    %137 = vector.shape_cast %136 : vector<8xf32> to vector<8x1xf32>
    %138 = tpu.reciprocal %137 {approx = true} : vector<8x1xf32> -> vector<8x1xf32>
    %139 = arith.mulf %137, %138 : vector<8x1xf32>
    %cst_50 = arith.constant 2.000000e+00 : f32
    %140 = vector.broadcast %cst_50 : f32 to vector<8x1xf32>
    %141 = arith.subf %140, %139 : vector<8x1xf32>
    %142 = arith.mulf %138, %141 : vector<8x1xf32>
    %143 = vector.broadcast %142 : vector<8x1xf32> to vector<8x8xf32>
    %144 = arith.mulf %135, %143 : vector<8x8xf32>
    %cst_51 = arith.constant dense<0.000000e+00> : vector<8x8xf32>
    %145 = tpu.matmul %144, %126, %cst_51 {dimension_numbers = #tpu.dot_dimension_numbers<[1], [0], [0], [1], [0, 0, 1, 1], [], []>} : vector<8x8xf32>, vector<8x8xf32>, vector<8x8xf32> -> vector<8x8xf32>
    %c8_52 = arith.constant 8 : index
    %c8_53 = arith.constant 8 : index
    %146 = vector.load %arg16[%c8_52, %c8_53] : memref<16x32xf32, #tpu.memory_space<vmem>>, vector<8x8xf32>
    tpu.vector_store %arg16[%c8_52, %c8_53], %145 {strides = array<i32>} : memref<16x32xf32, #tpu.memory_space<vmem>>, vector<8x8xf32>,
    %147 = vector.extract_strided_slice %8 {offsets = [8, 16], sizes = [8, 8], strides = [1, 1]} : vector<16x96xf32> to vector<8x8xf32>
    %148 = vector.extract_strided_slice %8 {offsets = [8, 48], sizes = [8, 8], strides = [1, 1]} : vector<16x96xf32> to vector<8x8xf32>
    %149 = vector.extract_strided_slice %8 {offsets = [8, 80], sizes = [8, 8], strides = [1, 1]} : vector<16x96xf32> to vector<8x8xf32>
    %150 = tpu.transpose %148, [1, 0] : vector<8x8xf32> -> vector<8x8xf32>
    %cst_54 = arith.constant dense<0.000000e+00> : vector<8x8xf32>
    %151 = tpu.matmul %147, %150, %cst_54 {dimension_numbers = #tpu.dot_dimension_numbers<[1], [0], [0], [1], [0, 0, 1, 1], [], []>} : vector<8x8xf32>, vector<8x8xf32>, vector<8x8xf32> -> vector<8x8xf32>
    %cst_55 = arith.constant 0.353553385 : f32
    %152 = vector.broadcast %cst_55 : f32 to vector<8x8xf32>
    %153 = arith.mulf %152, %151 : vector<8x8xf32>
    %cst_56 = arith.constant dense<0xFF800000> : vector<8xf32>
    %154 = vector.multi_reduction <maximumf>, %153, %cst_56 [1] : vector<8x8xf32> to vector<8xf32>
    %155 = vector.shape_cast %154 : vector<8xf32> to vector<8x1xf32>
    %156 = vector.broadcast %155 : vector<8x1xf32> to vector<8x8xf32>
    %157 = arith.subf %153, %156 : vector<8x8xf32>
    %158 = math.exp %157 : vector<8x8xf32>
    %cst_57 = arith.constant dense<0.000000e+00> : vector<8xf32>
    %159 = vector.multi_reduction <add>, %158, %cst_57 [1] : vector<8x8xf32> to vector<8xf32>
    %160 = vector.shape_cast %159 : vector<8xf32> to vector<8x1xf32>
    %161 = tpu.reciprocal %160 {approx = true} : vector<8x1xf32> -> vector<8x1xf32>
    %162 = arith.mulf %160, %161 : vector<8x1xf32>
    %cst_58 = arith.constant 2.000000e+00 : f32
    %163 = vector.broadcast %cst_58 : f32 to vector<8x1xf32>
    %164 = arith.subf %163, %162 : vector<8x1xf32>
    %165 = arith.mulf %161, %164 : vector<8x1xf32>
    %166 = vector.broadcast %165 : vector<8x1xf32> to vector<8x8xf32>
    %167 = arith.mulf %158, %166 : vector<8x8xf32>
    %cst_59 = arith.constant dense<0.000000e+00> : vector<8x8xf32>
    %168 = tpu.matmul %167, %149, %cst_59 {dimension_numbers = #tpu.dot_dimension_numbers<[1], [0], [0], [1], [0, 0, 1, 1], [], []>} : vector<8x8xf32>, vector<8x8xf32>, vector<8x8xf32> -> vector<8x8xf32>
    %c8_60 = arith.constant 8 : index
    %c16_61 = arith.constant 16 : index
    %169 = vector.load %arg16[%c8_60, %c16_61] : memref<16x32xf32, #tpu.memory_space<vmem>>, vector<8x8xf32>
    tpu.vector_store %arg16[%c8_60, %c16_61], %168 {strides = array<i32>} : memref<16x32xf32, #tpu.memory_space<vmem>>, vector<8x8xf32>,
    %170 = vector.extract_strided_slice %8 {offsets = [8, 24], sizes = [8, 8], strides = [1, 1]} : vector<16x96xf32> to vector<8x8xf32>
    %171 = vector.extract_strided_slice %8 {offsets = [8, 56], sizes = [8, 8], strides = [1, 1]} : vector<16x96xf32> to vector<8x8xf32>
    %172 = vector.extract_strided_slice %8 {offsets = [8, 88], sizes = [8, 8], strides = [1, 1]} : vector<16x96xf32> to vector<8x8xf32>
    %173 = tpu.transpose %171, [1, 0] : vector<8x8xf32> -> vector<8x8xf32>
    %cst_62 = arith.constant dense<0.000000e+00> : vector<8x8xf32>
    %174 = tpu.matmul %170, %173, %cst_62 {dimension_numbers = #tpu.dot_dimension_numbers<[1], [0], [0], [1], [0, 0, 1, 1], [], []>} : vector<8x8xf32>, vector<8x8xf32>, vector<8x8xf32> -> vector<8x8xf32>
    %cst_63 = arith.constant 0.353553385 : f32
    %175 = vector.broadcast %cst_63 : f32 to vector<8x8xf32>
    %176 = arith.mulf %175, %174 : vector<8x8xf32>
    %cst_64 = arith.constant dense<0xFF800000> : vector<8xf32>
    %177 = vector.multi_reduction <maximumf>, %176, %cst_64 [1] : vector<8x8xf32> to vector<8xf32>
    %178 = vector.shape_cast %177 : vector<8xf32> to vector<8x1xf32>
    %179 = vector.broadcast %178 : vector<8x1xf32> to vector<8x8xf32>
    %180 = arith.subf %176, %179 : vector<8x8xf32>
    %181 = math.exp %180 : vector<8x8xf32>
    %cst_65 = arith.constant dense<0.000000e+00> : vector<8xf32>
    %182 = vector.multi_reduction <add>, %181, %cst_65 [1] : vector<8x8xf32> to vector<8xf32>
    %183 = vector.shape_cast %182 : vector<8xf32> to vector<8x1xf32>
    %184 = tpu.reciprocal %183 {approx = true} : vector<8x1xf32> -> vector<8x1xf32>
    %185 = arith.mulf %183, %184 : vector<8x1xf32>
    %cst_66 = arith.constant 2.000000e+00 : f32
    %186 = vector.broadcast %cst_66 : f32 to vector<8x1xf32>
    %187 = arith.subf %186, %185 : vector<8x1xf32>
    %188 = arith.mulf %184, %187 : vector<8x1xf32>
    %189 = vector.broadcast %188 : vector<8x1xf32> to vector<8x8xf32>
    %190 = arith.mulf %181, %189 : vector<8x8xf32>
    %cst_67 = arith.constant dense<0.000000e+00> : vector<8x8xf32>
    %191 = tpu.matmul %190, %172, %cst_67 {dimension_numbers = #tpu.dot_dimension_numbers<[1], [0], [0], [1], [0, 0, 1, 1], [], []>} : vector<8x8xf32>, vector<8x8xf32>, vector<8x8xf32> -> vector<8x8xf32>
    %c8_68 = arith.constant 8 : index
    %c24_69 = arith.constant 24 : index
    %192 = vector.load %arg16[%c8_68, %c24_69] : memref<16x32xf32, #tpu.memory_space<vmem>>, vector<8x8xf32>
    tpu.vector_store %arg16[%c8_68, %c24_69], %191 {strides = array<i32>} : memref<16x32xf32, #tpu.memory_space<vmem>>, vector<8x8xf32>,
    %c0_70 = arith.constant 0 : index
    %c0_71 = arith.constant 0 : index
    %193 = vector.load %arg16[%c0_70, %c0_71] : memref<16x32xf32, #tpu.memory_space<vmem>>, vector<16x32xf32>
    %c0_72 = arith.constant 0 : index
    %c0_73 = arith.constant 0 : index
    %c0_74 = arith.constant 0 : index
    %194 = vector.load %arg5[%c0_72, %c0_73, %c0_74] : memref<2x32x32xf32, #tpu.memory_space<vmem>>, vector<1x32x32xf32>
    %195 = vector.shape_cast %194 : vector<1x32x32xf32> to vector<32x32xf32>
    %cst_75 = arith.constant dense<0.000000e+00> : vector<16x32xf32>
    %196 = tpu.matmul %193, %195, %cst_75 {dimension_numbers = #tpu.dot_dimension_numbers<[1], [0], [0], [1], [0, 0, 1, 1], [], []>} : vector<16x32xf32>, vector<32x32xf32>, vector<16x32xf32> -> vector<16x32xf32>
    %197 = arith.addf %5, %196 : vector<16x32xf32>
    %cst_76 = arith.constant dense<0.000000e+00> : vector<32xf32>
    %198 = vector.multi_reduction <add>, %197, %cst_76 [0] : vector<16x32xf32> to vector<32xf32>
    %199 = vector.shape_cast %198 : vector<32xf32> to vector<1x32xf32>
    %cst_77 = arith.constant 1.600000e+01 : f32
    %200 = vector.broadcast %cst_77 : f32 to vector<1x32xf32>
    %201 = arith.divf %199, %200 : vector<1x32xf32>
    %202 = vector.broadcast %201 : vector<1x32xf32> to vector<16x32xf32>
    %203 = arith.subf %197, %202 : vector<16x32xf32>
    %204 = arith.mulf %203, %203 : vector<16x32xf32>
    %cst_78 = arith.constant dense<0.000000e+00> : vector<32xf32>
    %205 = vector.multi_reduction <add>, %204, %cst_78 [0] : vector<16x32xf32> to vector<32xf32>
    %206 = vector.shape_cast %205 : vector<32xf32> to vector<1x32xf32>
    %cst_79 = arith.constant 1.600000e+01 : f32
    %207 = vector.broadcast %cst_79 : f32 to vector<1x32xf32>
    %208 = arith.divf %206, %207 : vector<1x32xf32>
    %cst_80 = arith.constant 9.99999974E-6 : f32
    %209 = vector.broadcast %cst_80 : f32 to vector<1x32xf32>
    %210 = arith.addf %208, %209 : vector<1x32xf32>
    %211 = math.rsqrt %210 : vector<1x32xf32>
    %212 = vector.broadcast %211 : vector<1x32xf32> to vector<16x32xf32>
    %213 = arith.mulf %203, %212 : vector<16x32xf32>
    %c0_81 = arith.constant 0 : index
    %c0_82 = arith.constant 0 : index
    %c0_83 = arith.constant 0 : index
    %214 = vector.load %arg6[%c0_81, %c0_82, %c0_83] : memref<2x1x32xf32, #tpu.memory_space<vmem>>, vector<1x1x32xf32>
    %215 = vector.shape_cast %214 : vector<1x1x32xf32> to vector<1x32xf32>
    %216 = vector.broadcast %215 : vector<1x32xf32> to vector<16x32xf32>
    %217 = arith.mulf %213, %216 : vector<16x32xf32>
    %c0_84 = arith.constant 0 : index
    %c0_85 = arith.constant 0 : index
    %c0_86 = arith.constant 0 : index
    %218 = vector.load %arg7[%c0_84, %c0_85, %c0_86] : memref<2x1x32xf32, #tpu.memory_space<vmem>>, vector<1x1x32xf32>
    %219 = vector.shape_cast %218 : vector<1x1x32xf32> to vector<1x32xf32>
    %220 = vector.broadcast %219 : vector<1x32xf32> to vector<16x32xf32>
    %221 = arith.addf %217, %220 : vector<16x32xf32>
    %c0_87 = arith.constant 0 : index
    %c0_88 = arith.constant 0 : index
    %c0_89 = arith.constant 0 : index
    %222 = vector.load %arg8[%c0_87, %c0_88, %c0_89] : memref<2x32x64xf32, #tpu.memory_space<vmem>>, vector<1x32x64xf32>
    %223 = vector.shape_cast %222 : vector<1x32x64xf32> to vector<32x64xf32>
    %cst_90 = arith.constant dense<0.000000e+00> : vector<16x64xf32>
    %224 = tpu.matmul %221, %223, %cst_90 {dimension_numbers = #tpu.dot_dimension_numbers<[1], [0], [0], [1], [0, 0, 1, 1], [], []>} : vector<16x32xf32>, vector<32x64xf32>, vector<16x64xf32> -> vector<16x64xf32>
    %c0_91 = arith.constant 0 : index
    %c0_92 = arith.constant 0 : index
    %c0_93 = arith.constant 0 : index
    %225 = vector.load %arg9[%c0_91, %c0_92, %c0_93] : memref<2x1x64xf32, #tpu.memory_space<vmem>>, vector<1x1x64xf32>
    %226 = vector.shape_cast %225 : vector<1x1x64xf32> to vector<1x64xf32>
    %227 = vector.broadcast %226 : vector<1x64xf32> to vector<16x64xf32>
    %228 = arith.addf %224, %227 : vector<16x64xf32>
    %cst_94 = arith.constant 0.000000e+00 : f32
    %229 = vector.broadcast %cst_94 : f32 to vector<16x64xf32>
    %230 = arith.maximumf %228, %229 : vector<16x64xf32>
    %c0_95 = arith.constant 0 : index
    %c0_96 = arith.constant 0 : index
    %c0_97 = arith.constant 0 : index
    %231 = vector.load %arg10[%c0_95, %c0_96, %c0_97] : memref<2x64x32xf32, #tpu.memory_space<vmem>>, vector<1x64x32xf32>
    %232 = vector.shape_cast %231 : vector<1x64x32xf32> to vector<64x32xf32>
    %cst_98 = arith.constant dense<0.000000e+00> : vector<16x32xf32>
    %233 = tpu.matmul %230, %232, %cst_98 {dimension_numbers = #tpu.dot_dimension_numbers<[1], [0], [0], [1], [0, 0, 1, 1], [], []>} : vector<16x64xf32>, vector<64x32xf32>, vector<16x32xf32> -> vector<16x32xf32>
    %c0_99 = arith.constant 0 : index
    %c0_100 = arith.constant 0 : index
    %c0_101 = arith.constant 0 : index
    %234 = vector.load %arg11[%c0_99, %c0_100, %c0_101] : memref<2x1x32xf32, #tpu.memory_space<vmem>>, vector<1x1x32xf32>
    %235 = vector.shape_cast %234 : vector<1x1x32xf32> to vector<1x32xf32>
    %236 = vector.broadcast %235 : vector<1x32xf32> to vector<16x32xf32>
    %237 = arith.addf %233, %236 : vector<16x32xf32>
    %238 = arith.addf %221, %237 : vector<16x32xf32>
    %cst_102 = arith.constant dense<0.000000e+00> : vector<32xf32>
    %239 = vector.multi_reduction <add>, %238, %cst_102 [0] : vector<16x32xf32> to vector<32xf32>
    %240 = vector.shape_cast %239 : vector<32xf32> to vector<1x32xf32>
    %cst_103 = arith.constant 1.600000e+01 : f32
    %241 = vector.broadcast %cst_103 : f32 to vector<1x32xf32>
    %242 = arith.divf %240, %241 : vector<1x32xf32>
    %243 = vector.broadcast %242 : vector<1x32xf32> to vector<16x32xf32>
    %244 = arith.subf %238, %243 : vector<16x32xf32>
    %245 = arith.mulf %244, %244 : vector<16x32xf32>
    %cst_104 = arith.constant dense<0.000000e+00> : vector<32xf32>
    %246 = vector.multi_reduction <add>, %245, %cst_104 [0] : vector<16x32xf32> to vector<32xf32>
    %247 = vector.shape_cast %246 : vector<32xf32> to vector<1x32xf32>
    %cst_105 = arith.constant 1.600000e+01 : f32
    %248 = vector.broadcast %cst_105 : f32 to vector<1x32xf32>
    %249 = arith.divf %247, %248 : vector<1x32xf32>
    %cst_106 = arith.constant 9.99999974E-6 : f32
    %250 = vector.broadcast %cst_106 : f32 to vector<1x32xf32>
    %251 = arith.addf %249, %250 : vector<1x32xf32>
    %252 = math.rsqrt %251 : vector<1x32xf32>
    %253 = vector.broadcast %252 : vector<1x32xf32> to vector<16x32xf32>
    %254 = arith.mulf %244, %253 : vector<16x32xf32>
    %c0_107 = arith.constant 0 : index
    %c0_108 = arith.constant 0 : index
    %c0_109 = arith.constant 0 : index
    %255 = vector.load %arg12[%c0_107, %c0_108, %c0_109] : memref<2x1x32xf32, #tpu.memory_space<vmem>>, vector<1x1x32xf32>
    %256 = vector.shape_cast %255 : vector<1x1x32xf32> to vector<1x32xf32>
    %257 = vector.broadcast %256 : vector<1x32xf32> to vector<16x32xf32>
    %258 = arith.mulf %254, %257 : vector<16x32xf32>
    %c0_110 = arith.constant 0 : index
    %c0_111 = arith.constant 0 : index
    %c0_112 = arith.constant 0 : index
    %259 = vector.load %arg13[%c0_110, %c0_111, %c0_112] : memref<2x1x32xf32, #tpu.memory_space<vmem>>, vector<1x1x32xf32>
    %260 = vector.shape_cast %259 : vector<1x1x32xf32> to vector<1x32xf32>
    %261 = vector.broadcast %260 : vector<1x32xf32> to vector<16x32xf32>
    %262 = arith.addf %258, %261 : vector<16x32xf32>
    %c1 = arith.constant 1 : index
    %c0_113 = arith.constant 0 : index
    %c0_114 = arith.constant 0 : index
    %263 = vector.load %arg4[%c1, %c0_113, %c0_114] : memref<2x32x96xf32, #tpu.memory_space<vmem>>, vector<1x32x96xf32>
    %264 = vector.shape_cast %263 : vector<1x32x96xf32> to vector<32x96xf32>
    %cst_115 = arith.constant dense<0.000000e+00> : vector<16x96xf32>
    %265 = tpu.matmul %262, %264, %cst_115 {dimension_numbers = #tpu.dot_dimension_numbers<[1], [0], [0], [1], [0, 0, 1, 1], [], []>} : vector<16x32xf32>, vector<32x96xf32>, vector<16x96xf32> -> vector<16x96xf32>
    %266 = vector.extract_strided_slice %265 {offsets = [0, 0], sizes = [8, 8], strides = [1, 1]} : vector<16x96xf32> to vector<8x8xf32>
    %267 = vector.extract_strided_slice %265 {offsets = [0, 32], sizes = [8, 8], strides = [1, 1]} : vector<16x96xf32> to vector<8x8xf32>
    %268 = vector.extract_strided_slice %265 {offsets = [0, 64], sizes = [8, 8], strides = [1, 1]} : vector<16x96xf32> to vector<8x8xf32>
    %269 = tpu.transpose %267, [1, 0] : vector<8x8xf32> -> vector<8x8xf32>
    %cst_116 = arith.constant dense<0.000000e+00> : vector<8x8xf32>
    %270 = tpu.matmul %266, %269, %cst_116 {dimension_numbers = #tpu.dot_dimension_numbers<[1], [0], [0], [1], [0, 0, 1, 1], [], []>} : vector<8x8xf32>, vector<8x8xf32>, vector<8x8xf32> -> vector<8x8xf32>
    %cst_117 = arith.constant 0.353553385 : f32
    %271 = vector.broadcast %cst_117 : f32 to vector<8x8xf32>
    %272 = arith.mulf %271, %270 : vector<8x8xf32>
    %cst_118 = arith.constant dense<0xFF800000> : vector<8xf32>
    %273 = vector.multi_reduction <maximumf>, %272, %cst_118 [1] : vector<8x8xf32> to vector<8xf32>
    %274 = vector.shape_cast %273 : vector<8xf32> to vector<8x1xf32>
    %275 = vector.broadcast %274 : vector<8x1xf32> to vector<8x8xf32>
    %276 = arith.subf %272, %275 : vector<8x8xf32>
    %277 = math.exp %276 : vector<8x8xf32>
    %cst_119 = arith.constant dense<0.000000e+00> : vector<8xf32>
    %278 = vector.multi_reduction <add>, %277, %cst_119 [1] : vector<8x8xf32> to vector<8xf32>
    %279 = vector.shape_cast %278 : vector<8xf32> to vector<8x1xf32>
    %280 = tpu.reciprocal %279 {approx = true} : vector<8x1xf32> -> vector<8x1xf32>
    %281 = arith.mulf %279, %280 : vector<8x1xf32>
    %cst_120 = arith.constant 2.000000e+00 : f32
    %282 = vector.broadcast %cst_120 : f32 to vector<8x1xf32>
    %283 = arith.subf %282, %281 : vector<8x1xf32>
    %284 = arith.mulf %280, %283 : vector<8x1xf32>
    %285 = vector.broadcast %284 : vector<8x1xf32> to vector<8x8xf32>
    %286 = arith.mulf %277, %285 : vector<8x8xf32>
    %cst_121 = arith.constant dense<0.000000e+00> : vector<8x8xf32>
    %287 = tpu.matmul %286, %268, %cst_121 {dimension_numbers = #tpu.dot_dimension_numbers<[1], [0], [0], [1], [0, 0, 1, 1], [], []>} : vector<8x8xf32>, vector<8x8xf32>, vector<8x8xf32> -> vector<8x8xf32>
    %c0_122 = arith.constant 0 : index
    %c0_123 = arith.constant 0 : index
    %288 = vector.load %arg16[%c0_122, %c0_123] : memref<16x32xf32, #tpu.memory_space<vmem>>, vector<8x8xf32>
    tpu.vector_store %arg16[%c0_122, %c0_123], %287 {strides = array<i32>} : memref<16x32xf32, #tpu.memory_space<vmem>>, vector<8x8xf32>,
    %289 = vector.extract_strided_slice %265 {offsets = [0, 8], sizes = [8, 8], strides = [1, 1]} : vector<16x96xf32> to vector<8x8xf32>
    %290 = vector.extract_strided_slice %265 {offsets = [0, 40], sizes = [8, 8], strides = [1, 1]} : vector<16x96xf32> to vector<8x8xf32>
    %291 = vector.extract_strided_slice %265 {offsets = [0, 72], sizes = [8, 8], strides = [1, 1]} : vector<16x96xf32> to vector<8x8xf32>
    %292 = tpu.transpose %290, [1, 0] : vector<8x8xf32> -> vector<8x8xf32>
    %cst_124 = arith.constant dense<0.000000e+00> : vector<8x8xf32>
    %293 = tpu.matmul %289, %292, %cst_124 {dimension_numbers = #tpu.dot_dimension_numbers<[1], [0], [0], [1], [0, 0, 1, 1], [], []>} : vector<8x8xf32>, vector<8x8xf32>, vector<8x8xf32> -> vector<8x8xf32>
    %cst_125 = arith.constant 0.353553385 : f32
    %294 = vector.broadcast %cst_125 : f32 to vector<8x8xf32>
    %295 = arith.mulf %294, %293 : vector<8x8xf32>
    %cst_126 = arith.constant dense<0xFF800000> : vector<8xf32>
    %296 = vector.multi_reduction <maximumf>, %295, %cst_126 [1] : vector<8x8xf32> to vector<8xf32>
    %297 = vector.shape_cast %296 : vector<8xf32> to vector<8x1xf32>
    %298 = vector.broadcast %297 : vector<8x1xf32> to vector<8x8xf32>
    %299 = arith.subf %295, %298 : vector<8x8xf32>
    %300 = math.exp %299 : vector<8x8xf32>
    %cst_127 = arith.constant dense<0.000000e+00> : vector<8xf32>
    %301 = vector.multi_reduction <add>, %300, %cst_127 [1] : vector<8x8xf32> to vector<8xf32>
    %302 = vector.shape_cast %301 : vector<8xf32> to vector<8x1xf32>
    %303 = tpu.reciprocal %302 {approx = true} : vector<8x1xf32> -> vector<8x1xf32>
    %304 = arith.mulf %302, %303 : vector<8x1xf32>
    %cst_128 = arith.constant 2.000000e+00 : f32
    %305 = vector.broadcast %cst_128 : f32 to vector<8x1xf32>
    %306 = arith.subf %305, %304 : vector<8x1xf32>
    %307 = arith.mulf %303, %306 : vector<8x1xf32>
    %308 = vector.broadcast %307 : vector<8x1xf32> to vector<8x8xf32>
    %309 = arith.mulf %300, %308 : vector<8x8xf32>
    %cst_129 = arith.constant dense<0.000000e+00> : vector<8x8xf32>
    %310 = tpu.matmul %309, %291, %cst_129 {dimension_numbers = #tpu.dot_dimension_numbers<[1], [0], [0], [1], [0, 0, 1, 1], [], []>} : vector<8x8xf32>, vector<8x8xf32>, vector<8x8xf32> -> vector<8x8xf32>
    %c0_130 = arith.constant 0 : index
    %c8_131 = arith.constant 8 : index
    %311 = vector.load %arg16[%c0_130, %c8_131] : memref<16x32xf32, #tpu.memory_space<vmem>>, vector<8x8xf32>
    tpu.vector_store %arg16[%c0_130, %c8_131], %310 {strides = array<i32>} : memref<16x32xf32, #tpu.memory_space<vmem>>, vector<8x8xf32>,
    %312 = vector.extract_strided_slice %265 {offsets = [0, 16], sizes = [8, 8], strides = [1, 1]} : vector<16x96xf32> to vector<8x8xf32>
    %313 = vector.extract_strided_slice %265 {offsets = [0, 48], sizes = [8, 8], strides = [1, 1]} : vector<16x96xf32> to vector<8x8xf32>
    %314 = vector.extract_strided_slice %265 {offsets = [0, 80], sizes = [8, 8], strides = [1, 1]} : vector<16x96xf32> to vector<8x8xf32>
    %315 = tpu.transpose %313, [1, 0] : vector<8x8xf32> -> vector<8x8xf32>
    %cst_132 = arith.constant dense<0.000000e+00> : vector<8x8xf32>
    %316 = tpu.matmul %312, %315, %cst_132 {dimension_numbers = #tpu.dot_dimension_numbers<[1], [0], [0], [1], [0, 0, 1, 1], [], []>} : vector<8x8xf32>, vector<8x8xf32>, vector<8x8xf32> -> vector<8x8xf32>
    %cst_133 = arith.constant 0.353553385 : f32
    %317 = vector.broadcast %cst_133 : f32 to vector<8x8xf32>
    %318 = arith.mulf %317, %316 : vector<8x8xf32>
    %cst_134 = arith.constant dense<0xFF800000> : vector<8xf32>
    %319 = vector.multi_reduction <maximumf>, %318, %cst_134 [1] : vector<8x8xf32> to vector<8xf32>
    %320 = vector.shape_cast %319 : vector<8xf32> to vector<8x1xf32>
    %321 = vector.broadcast %320 : vector<8x1xf32> to vector<8x8xf32>
    %322 = arith.subf %318, %321 : vector<8x8xf32>
    %323 = math.exp %322 : vector<8x8xf32>
    %cst_135 = arith.constant dense<0.000000e+00> : vector<8xf32>
    %324 = vector.multi_reduction <add>, %323, %cst_135 [1] : vector<8x8xf32> to vector<8xf32>
    %325 = vector.shape_cast %324 : vector<8xf32> to vector<8x1xf32>
    %326 = tpu.reciprocal %325 {approx = true} : vector<8x1xf32> -> vector<8x1xf32>
    %327 = arith.mulf %325, %326 : vector<8x1xf32>
    %cst_136 = arith.constant 2.000000e+00 : f32
    %328 = vector.broadcast %cst_136 : f32 to vector<8x1xf32>
    %329 = arith.subf %328, %327 : vector<8x1xf32>
    %330 = arith.mulf %326, %329 : vector<8x1xf32>
    %331 = vector.broadcast %330 : vector<8x1xf32> to vector<8x8xf32>
    %332 = arith.mulf %323, %331 : vector<8x8xf32>
    %cst_137 = arith.constant dense<0.000000e+00> : vector<8x8xf32>
    %333 = tpu.matmul %332, %314, %cst_137 {dimension_numbers = #tpu.dot_dimension_numbers<[1], [0], [0], [1], [0, 0, 1, 1], [], []>} : vector<8x8xf32>, vector<8x8xf32>, vector<8x8xf32> -> vector<8x8xf32>
    %c0_138 = arith.constant 0 : index
    %c16_139 = arith.constant 16 : index
    %334 = vector.load %arg16[%c0_138, %c16_139] : memref<16x32xf32, #tpu.memory_space<vmem>>, vector<8x8xf32>
    tpu.vector_store %arg16[%c0_138, %c16_139], %333 {strides = array<i32>} : memref<16x32xf32, #tpu.memory_space<vmem>>, vector<8x8xf32>,
    %335 = vector.extract_strided_slice %265 {offsets = [0, 24], sizes = [8, 8], strides = [1, 1]} : vector<16x96xf32> to vector<8x8xf32>
    %336 = vector.extract_strided_slice %265 {offsets = [0, 56], sizes = [8, 8], strides = [1, 1]} : vector<16x96xf32> to vector<8x8xf32>
    %337 = vector.extract_strided_slice %265 {offsets = [0, 88], sizes = [8, 8], strides = [1, 1]} : vector<16x96xf32> to vector<8x8xf32>
    %338 = tpu.transpose %336, [1, 0] : vector<8x8xf32> -> vector<8x8xf32>
    %cst_140 = arith.constant dense<0.000000e+00> : vector<8x8xf32>
    %339 = tpu.matmul %335, %338, %cst_140 {dimension_numbers = #tpu.dot_dimension_numbers<[1], [0], [0], [1], [0, 0, 1, 1], [], []>} : vector<8x8xf32>, vector<8x8xf32>, vector<8x8xf32> -> vector<8x8xf32>
    %cst_141 = arith.constant 0.353553385 : f32
    %340 = vector.broadcast %cst_141 : f32 to vector<8x8xf32>
    %341 = arith.mulf %340, %339 : vector<8x8xf32>
    %cst_142 = arith.constant dense<0xFF800000> : vector<8xf32>
    %342 = vector.multi_reduction <maximumf>, %341, %cst_142 [1] : vector<8x8xf32> to vector<8xf32>
    %343 = vector.shape_cast %342 : vector<8xf32> to vector<8x1xf32>
    %344 = vector.broadcast %343 : vector<8x1xf32> to vector<8x8xf32>
    %345 = arith.subf %341, %344 : vector<8x8xf32>
    %346 = math.exp %345 : vector<8x8xf32>
    %cst_143 = arith.constant dense<0.000000e+00> : vector<8xf32>
    %347 = vector.multi_reduction <add>, %346, %cst_143 [1] : vector<8x8xf32> to vector<8xf32>
    %348 = vector.shape_cast %347 : vector<8xf32> to vector<8x1xf32>
    %349 = tpu.reciprocal %348 {approx = true} : vector<8x1xf32> -> vector<8x1xf32>
    %350 = arith.mulf %348, %349 : vector<8x1xf32>
    %cst_144 = arith.constant 2.000000e+00 : f32
    %351 = vector.broadcast %cst_144 : f32 to vector<8x1xf32>
    %352 = arith.subf %351, %350 : vector<8x1xf32>
    %353 = arith.mulf %349, %352 : vector<8x1xf32>
    %354 = vector.broadcast %353 : vector<8x1xf32> to vector<8x8xf32>
    %355 = arith.mulf %346, %354 : vector<8x8xf32>
    %cst_145 = arith.constant dense<0.000000e+00> : vector<8x8xf32>
    %356 = tpu.matmul %355, %337, %cst_145 {dimension_numbers = #tpu.dot_dimension_numbers<[1], [0], [0], [1], [0, 0, 1, 1], [], []>} : vector<8x8xf32>, vector<8x8xf32>, vector<8x8xf32> -> vector<8x8xf32>
    %c0_146 = arith.constant 0 : index
    %c24_147 = arith.constant 24 : index
    %357 = vector.load %arg16[%c0_146, %c24_147] : memref<16x32xf32, #tpu.memory_space<vmem>>, vector<8x8xf32>
    tpu.vector_store %arg16[%c0_146, %c24_147], %356 {strides = array<i32>} : memref<16x32xf32, #tpu.memory_space<vmem>>, vector<8x8xf32>,
    %358 = vector.extract_strided_slice %265 {offsets = [8, 0], sizes = [8, 8], strides = [1, 1]} : vector<16x96xf32> to vector<8x8xf32>
    %359 = vector.extract_strided_slice %265 {offsets = [8, 32], sizes = [8, 8], strides = [1, 1]} : vector<16x96xf32> to vector<8x8xf32>
    %360 = vector.extract_strided_slice %265 {offsets = [8, 64], sizes = [8, 8], strides = [1, 1]} : vector<16x96xf32> to vector<8x8xf32>
    %361 = tpu.transpose %359, [1, 0] : vector<8x8xf32> -> vector<8x8xf32>
    %cst_148 = arith.constant dense<0.000000e+00> : vector<8x8xf32>
    %362 = tpu.matmul %358, %361, %cst_148 {dimension_numbers = #tpu.dot_dimension_numbers<[1], [0], [0], [1], [0, 0, 1, 1], [], []>} : vector<8x8xf32>, vector<8x8xf32>, vector<8x8xf32> -> vector<8x8xf32>
    %cst_149 = arith.constant 0.353553385 : f32
    %363 = vector.broadcast %cst_149 : f32 to vector<8x8xf32>
    %364 = arith.mulf %363, %362 : vector<8x8xf32>
    %cst_150 = arith.constant dense<0xFF800000> : vector<8xf32>
    %365 = vector.multi_reduction <maximumf>, %364, %cst_150 [1] : vector<8x8xf32> to vector<8xf32>
    %366 = vector.shape_cast %365 : vector<8xf32> to vector<8x1xf32>
    %367 = vector.broadcast %366 : vector<8x1xf32> to vector<8x8xf32>
    %368 = arith.subf %364, %367 : vector<8x8xf32>
    %369 = math.exp %368 : vector<8x8xf32>
    %cst_151 = arith.constant dense<0.000000e+00> : vector<8xf32>
    %370 = vector.multi_reduction <add>, %369, %cst_151 [1] : vector<8x8xf32> to vector<8xf32>
    %371 = vector.shape_cast %370 : vector<8xf32> to vector<8x1xf32>
    %372 = tpu.reciprocal %371 {approx = true} : vector<8x1xf32> -> vector<8x1xf32>
    %373 = arith.mulf %371, %372 : vector<8x1xf32>
    %cst_152 = arith.constant 2.000000e+00 : f32
    %374 = vector.broadcast %cst_152 : f32 to vector<8x1xf32>
    %375 = arith.subf %374, %373 : vector<8x1xf32>
    %376 = arith.mulf %372, %375 : vector<8x1xf32>
    %377 = vector.broadcast %376 : vector<8x1xf32> to vector<8x8xf32>
    %378 = arith.mulf %369, %377 : vector<8x8xf32>
    %cst_153 = arith.constant dense<0.000000e+00> : vector<8x8xf32>
    %379 = tpu.matmul %378, %360, %cst_153 {dimension_numbers = #tpu.dot_dimension_numbers<[1], [0], [0], [1], [0, 0, 1, 1], [], []>} : vector<8x8xf32>, vector<8x8xf32>, vector<8x8xf32> -> vector<8x8xf32>
    %c8_154 = arith.constant 8 : index
    %c0_155 = arith.constant 0 : index
    %380 = vector.load %arg16[%c8_154, %c0_155] : memref<16x32xf32, #tpu.memory_space<vmem>>, vector<8x8xf32>
    tpu.vector_store %arg16[%c8_154, %c0_155], %379 {strides = array<i32>} : memref<16x32xf32, #tpu.memory_space<vmem>>, vector<8x8xf32>,
    %381 = vector.extract_strided_slice %265 {offsets = [8, 8], sizes = [8, 8], strides = [1, 1]} : vector<16x96xf32> to vector<8x8xf32>
    %382 = vector.extract_strided_slice %265 {offsets = [8, 40], sizes = [8, 8], strides = [1, 1]} : vector<16x96xf32> to vector<8x8xf32>
    %383 = vector.extract_strided_slice %265 {offsets = [8, 72], sizes = [8, 8], strides = [1, 1]} : vector<16x96xf32> to vector<8x8xf32>
    %384 = tpu.transpose %382, [1, 0] : vector<8x8xf32> -> vector<8x8xf32>
    %cst_156 = arith.constant dense<0.000000e+00> : vector<8x8xf32>
    %385 = tpu.matmul %381, %384, %cst_156 {dimension_numbers = #tpu.dot_dimension_numbers<[1], [0], [0], [1], [0, 0, 1, 1], [], []>} : vector<8x8xf32>, vector<8x8xf32>, vector<8x8xf32> -> vector<8x8xf32>
    %cst_157 = arith.constant 0.353553385 : f32
    %386 = vector.broadcast %cst_157 : f32 to vector<8x8xf32>
    %387 = arith.mulf %386, %385 : vector<8x8xf32>
    %cst_158 = arith.constant dense<0xFF800000> : vector<8xf32>
    %388 = vector.multi_reduction <maximumf>, %387, %cst_158 [1] : vector<8x8xf32> to vector<8xf32>
    %389 = vector.shape_cast %388 : vector<8xf32> to vector<8x1xf32>
    %390 = vector.broadcast %389 : vector<8x1xf32> to vector<8x8xf32>
    %391 = arith.subf %387, %390 : vector<8x8xf32>
    %392 = math.exp %391 : vector<8x8xf32>
    %cst_159 = arith.constant dense<0.000000e+00> : vector<8xf32>
    %393 = vector.multi_reduction <add>, %392, %cst_159 [1] : vector<8x8xf32> to vector<8xf32>
    %394 = vector.shape_cast %393 : vector<8xf32> to vector<8x1xf32>
    %395 = tpu.reciprocal %394 {approx = true} : vector<8x1xf32> -> vector<8x1xf32>
    %396 = arith.mulf %394, %395 : vector<8x1xf32>
    %cst_160 = arith.constant 2.000000e+00 : f32
    %397 = vector.broadcast %cst_160 : f32 to vector<8x1xf32>
    %398 = arith.subf %397, %396 : vector<8x1xf32>
    %399 = arith.mulf %395, %398 : vector<8x1xf32>
    %400 = vector.broadcast %399 : vector<8x1xf32> to vector<8x8xf32>
    %401 = arith.mulf %392, %400 : vector<8x8xf32>
    %cst_161 = arith.constant dense<0.000000e+00> : vector<8x8xf32>
    %402 = tpu.matmul %401, %383, %cst_161 {dimension_numbers = #tpu.dot_dimension_numbers<[1], [0], [0], [1], [0, 0, 1, 1], [], []>} : vector<8x8xf32>, vector<8x8xf32>, vector<8x8xf32> -> vector<8x8xf32>
    %c8_162 = arith.constant 8 : index
    %c8_163 = arith.constant 8 : index
    %403 = vector.load %arg16[%c8_162, %c8_163] : memref<16x32xf32, #tpu.memory_space<vmem>>, vector<8x8xf32>
    tpu.vector_store %arg16[%c8_162, %c8_163], %402 {strides = array<i32>} : memref<16x32xf32, #tpu.memory_space<vmem>>, vector<8x8xf32>,
    %404 = vector.extract_strided_slice %265 {offsets = [8, 16], sizes = [8, 8], strides = [1, 1]} : vector<16x96xf32> to vector<8x8xf32>
    %405 = vector.extract_strided_slice %265 {offsets = [8, 48], sizes = [8, 8], strides = [1, 1]} : vector<16x96xf32> to vector<8x8xf32>
    %406 = vector.extract_strided_slice %265 {offsets = [8, 80], sizes = [8, 8], strides = [1, 1]} : vector<16x96xf32> to vector<8x8xf32>
    %407 = tpu.transpose %405, [1, 0] : vector<8x8xf32> -> vector<8x8xf32>
    %cst_164 = arith.constant dense<0.000000e+00> : vector<8x8xf32>
    %408 = tpu.matmul %404, %407, %cst_164 {dimension_numbers = #tpu.dot_dimension_numbers<[1], [0], [0], [1], [0, 0, 1, 1], [], []>} : vector<8x8xf32>, vector<8x8xf32>, vector<8x8xf32> -> vector<8x8xf32>
    %cst_165 = arith.constant 0.353553385 : f32
    %409 = vector.broadcast %cst_165 : f32 to vector<8x8xf32>
    %410 = arith.mulf %409, %408 : vector<8x8xf32>
    %cst_166 = arith.constant dense<0xFF800000> : vector<8xf32>
    %411 = vector.multi_reduction <maximumf>, %410, %cst_166 [1] : vector<8x8xf32> to vector<8xf32>
    %412 = vector.shape_cast %411 : vector<8xf32> to vector<8x1xf32>
    %413 = vector.broadcast %412 : vector<8x1xf32> to vector<8x8xf32>
    %414 = arith.subf %410, %413 : vector<8x8xf32>
    %415 = math.exp %414 : vector<8x8xf32>
    %cst_167 = arith.constant dense<0.000000e+00> : vector<8xf32>
    %416 = vector.multi_reduction <add>, %415, %cst_167 [1] : vector<8x8xf32> to vector<8xf32>
    %417 = vector.shape_cast %416 : vector<8xf32> to vector<8x1xf32>
    %418 = tpu.reciprocal %417 {approx = true} : vector<8x1xf32> -> vector<8x1xf32>
    %419 = arith.mulf %417, %418 : vector<8x1xf32>
    %cst_168 = arith.constant 2.000000e+00 : f32
    %420 = vector.broadcast %cst_168 : f32 to vector<8x1xf32>
    %421 = arith.subf %420, %419 : vector<8x1xf32>
    %422 = arith.mulf %418, %421 : vector<8x1xf32>
    %423 = vector.broadcast %422 : vector<8x1xf32> to vector<8x8xf32>
    %424 = arith.mulf %415, %423 : vector<8x8xf32>
    %cst_169 = arith.constant dense<0.000000e+00> : vector<8x8xf32>
    %425 = tpu.matmul %424, %406, %cst_169 {dimension_numbers = #tpu.dot_dimension_numbers<[1], [0], [0], [1], [0, 0, 1, 1], [], []>} : vector<8x8xf32>, vector<8x8xf32>, vector<8x8xf32> -> vector<8x8xf32>
    %c8_170 = arith.constant 8 : index
    %c16_171 = arith.constant 16 : index
    %426 = vector.load %arg16[%c8_170, %c16_171] : memref<16x32xf32, #tpu.memory_space<vmem>>, vector<8x8xf32>
    tpu.vector_store %arg16[%c8_170, %c16_171], %425 {strides = array<i32>} : memref<16x32xf32, #tpu.memory_space<vmem>>, vector<8x8xf32>,
    %427 = vector.extract_strided_slice %265 {offsets = [8, 24], sizes = [8, 8], strides = [1, 1]} : vector<16x96xf32> to vector<8x8xf32>
    %428 = vector.extract_strided_slice %265 {offsets = [8, 56], sizes = [8, 8], strides = [1, 1]} : vector<16x96xf32> to vector<8x8xf32>
    %429 = vector.extract_strided_slice %265 {offsets = [8, 88], sizes = [8, 8], strides = [1, 1]} : vector<16x96xf32> to vector<8x8xf32>
    %430 = tpu.transpose %428, [1, 0] : vector<8x8xf32> -> vector<8x8xf32>
    %cst_172 = arith.constant dense<0.000000e+00> : vector<8x8xf32>
    %431 = tpu.matmul %427, %430, %cst_172 {dimension_numbers = #tpu.dot_dimension_numbers<[1], [0], [0], [1], [0, 0, 1, 1], [], []>} : vector<8x8xf32>, vector<8x8xf32>, vector<8x8xf32> -> vector<8x8xf32>
    %cst_173 = arith.constant 0.353553385 : f32
    %432 = vector.broadcast %cst_173 : f32 to vector<8x8xf32>
    %433 = arith.mulf %432, %431 : vector<8x8xf32>
    %cst_174 = arith.constant dense<0xFF800000> : vector<8xf32>
    %434 = vector.multi_reduction <maximumf>, %433, %cst_174 [1] : vector<8x8xf32> to vector<8xf32>
    %435 = vector.shape_cast %434 : vector<8xf32> to vector<8x1xf32>
    %436 = vector.broadcast %435 : vector<8x1xf32> to vector<8x8xf32>
    %437 = arith.subf %433, %436 : vector<8x8xf32>
    %438 = math.exp %437 : vector<8x8xf32>
    %cst_175 = arith.constant dense<0.000000e+00> : vector<8xf32>
    %439 = vector.multi_reduction <add>, %438, %cst_175 [1] : vector<8x8xf32> to vector<8xf32>
    %440 = vector.shape_cast %439 : vector<8xf32> to vector<8x1xf32>
    %441 = tpu.reciprocal %440 {approx = true} : vector<8x1xf32> -> vector<8x1xf32>
    %442 = arith.mulf %440, %441 : vector<8x1xf32>
    %cst_176 = arith.constant 2.000000e+00 : f32
    %443 = vector.broadcast %cst_176 : f32 to vector<8x1xf32>
    %444 = arith.subf %443, %442 : vector<8x1xf32>
    %445 = arith.mulf %441, %444 : vector<8x1xf32>
    %446 = vector.broadcast %445 : vector<8x1xf32> to vector<8x8xf32>
    %447 = arith.mulf %438, %446 : vector<8x8xf32>
    %cst_177 = arith.constant dense<0.000000e+00> : vector<8x8xf32>
    %448 = tpu.matmul %447, %429, %cst_177 {dimension_numbers = #tpu.dot_dimension_numbers<[1], [0], [0], [1], [0, 0, 1, 1], [], []>} : vector<8x8xf32>, vector<8x8xf32>, vector<8x8xf32> -> vector<8x8xf32>
    %c8_178 = arith.constant 8 : index
    %c24_179 = arith.constant 24 : index
    %449 = vector.load %arg16[%c8_178, %c24_179] : memref<16x32xf32, #tpu.memory_space<vmem>>, vector<8x8xf32>
    tpu.vector_store %arg16[%c8_178, %c24_179], %448 {strides = array<i32>} : memref<16x32xf32, #tpu.memory_space<vmem>>, vector<8x8xf32>,
    %c0_180 = arith.constant 0 : index
    %c0_181 = arith.constant 0 : index
    %450 = vector.load %arg16[%c0_180, %c0_181] : memref<16x32xf32, #tpu.memory_space<vmem>>, vector<16x32xf32>
    %c1_182 = arith.constant 1 : index
    %c0_183 = arith.constant 0 : index
    %c0_184 = arith.constant 0 : index
    %451 = vector.load %arg5[%c1_182, %c0_183, %c0_184] : memref<2x32x32xf32, #tpu.memory_space<vmem>>, vector<1x32x32xf32>
    %452 = vector.shape_cast %451 : vector<1x32x32xf32> to vector<32x32xf32>
    %cst_185 = arith.constant dense<0.000000e+00> : vector<16x32xf32>
    %453 = tpu.matmul %450, %452, %cst_185 {dimension_numbers = #tpu.dot_dimension_numbers<[1], [0], [0], [1], [0, 0, 1, 1], [], []>} : vector<16x32xf32>, vector<32x32xf32>, vector<16x32xf32> -> vector<16x32xf32>
    %454 = arith.addf %262, %453 : vector<16x32xf32>
    %cst_186 = arith.constant dense<0.000000e+00> : vector<32xf32>
    %455 = vector.multi_reduction <add>, %454, %cst_186 [0] : vector<16x32xf32> to vector<32xf32>
    %456 = vector.shape_cast %455 : vector<32xf32> to vector<1x32xf32>
    %cst_187 = arith.constant 1.600000e+01 : f32
    %457 = vector.broadcast %cst_187 : f32 to vector<1x32xf32>
    %458 = arith.divf %456, %457 : vector<1x32xf32>
    %459 = vector.broadcast %458 : vector<1x32xf32> to vector<16x32xf32>
    %460 = arith.subf %454, %459 : vector<16x32xf32>
    %461 = arith.mulf %460, %460 : vector<16x32xf32>
    %cst_188 = arith.constant dense<0.000000e+00> : vector<32xf32>
    %462 = vector.multi_reduction <add>, %461, %cst_188 [0] : vector<16x32xf32> to vector<32xf32>
    %463 = vector.shape_cast %462 : vector<32xf32> to vector<1x32xf32>
    %cst_189 = arith.constant 1.600000e+01 : f32
    %464 = vector.broadcast %cst_189 : f32 to vector<1x32xf32>
    %465 = arith.divf %463, %464 : vector<1x32xf32>
    %cst_190 = arith.constant 9.99999974E-6 : f32
    %466 = vector.broadcast %cst_190 : f32 to vector<1x32xf32>
    %467 = arith.addf %465, %466 : vector<1x32xf32>
    %468 = math.rsqrt %467 : vector<1x32xf32>
    %469 = vector.broadcast %468 : vector<1x32xf32> to vector<16x32xf32>
    %470 = arith.mulf %460, %469 : vector<16x32xf32>
    %c1_191 = arith.constant 1 : index
    %c0_192 = arith.constant 0 : index
    %c0_193 = arith.constant 0 : index
    %471 = vector.load %arg6[%c1_191, %c0_192, %c0_193] : memref<2x1x32xf32, #tpu.memory_space<vmem>>, vector<1x1x32xf32>
    %472 = vector.shape_cast %471 : vector<1x1x32xf32> to vector<1x32xf32>
    %473 = vector.broadcast %472 : vector<1x32xf32> to vector<16x32xf32>
    %474 = arith.mulf %470, %473 : vector<16x32xf32>
    %c1_194 = arith.constant 1 : index
    %c0_195 = arith.constant 0 : index
    %c0_196 = arith.constant 0 : index
    %475 = vector.load %arg7[%c1_194, %c0_195, %c0_196] : memref<2x1x32xf32, #tpu.memory_space<vmem>>, vector<1x1x32xf32>
    %476 = vector.shape_cast %475 : vector<1x1x32xf32> to vector<1x32xf32>
    %477 = vector.broadcast %476 : vector<1x32xf32> to vector<16x32xf32>
    %478 = arith.addf %474, %477 : vector<16x32xf32>
    %c1_197 = arith.constant 1 : index
    %c0_198 = arith.constant 0 : index
    %c0_199 = arith.constant 0 : index
    %479 = vector.load %arg8[%c1_197, %c0_198, %c0_199] : memref<2x32x64xf32, #tpu.memory_space<vmem>>, vector<1x32x64xf32>
    %480 = vector.shape_cast %479 : vector<1x32x64xf32> to vector<32x64xf32>
    %cst_200 = arith.constant dense<0.000000e+00> : vector<16x64xf32>
    %481 = tpu.matmul %478, %480, %cst_200 {dimension_numbers = #tpu.dot_dimension_numbers<[1], [0], [0], [1], [0, 0, 1, 1], [], []>} : vector<16x32xf32>, vector<32x64xf32>, vector<16x64xf32> -> vector<16x64xf32>
    %c1_201 = arith.constant 1 : index
    %c0_202 = arith.constant 0 : index
    %c0_203 = arith.constant 0 : index
    %482 = vector.load %arg9[%c1_201, %c0_202, %c0_203] : memref<2x1x64xf32, #tpu.memory_space<vmem>>, vector<1x1x64xf32>
    %483 = vector.shape_cast %482 : vector<1x1x64xf32> to vector<1x64xf32>
    %484 = vector.broadcast %483 : vector<1x64xf32> to vector<16x64xf32>
    %485 = arith.addf %481, %484 : vector<16x64xf32>
    %cst_204 = arith.constant 0.000000e+00 : f32
    %486 = vector.broadcast %cst_204 : f32 to vector<16x64xf32>
    %487 = arith.maximumf %485, %486 : vector<16x64xf32>
    %c1_205 = arith.constant 1 : index
    %c0_206 = arith.constant 0 : index
    %c0_207 = arith.constant 0 : index
    %488 = vector.load %arg10[%c1_205, %c0_206, %c0_207] : memref<2x64x32xf32, #tpu.memory_space<vmem>>, vector<1x64x32xf32>
    %489 = vector.shape_cast %488 : vector<1x64x32xf32> to vector<64x32xf32>
    %cst_208 = arith.constant dense<0.000000e+00> : vector<16x32xf32>
    %490 = tpu.matmul %487, %489, %cst_208 {dimension_numbers = #tpu.dot_dimension_numbers<[1], [0], [0], [1], [0, 0, 1, 1], [], []>} : vector<16x64xf32>, vector<64x32xf32>, vector<16x32xf32> -> vector<16x32xf32>
    %c1_209 = arith.constant 1 : index
    %c0_210 = arith.constant 0 : index
    %c0_211 = arith.constant 0 : index
    %491 = vector.load %arg11[%c1_209, %c0_210, %c0_211] : memref<2x1x32xf32, #tpu.memory_space<vmem>>, vector<1x1x32xf32>
    %492 = vector.shape_cast %491 : vector<1x1x32xf32> to vector<1x32xf32>
    %493 = vector.broadcast %492 : vector<1x32xf32> to vector<16x32xf32>
    %494 = arith.addf %490, %493 : vector<16x32xf32>
    %495 = arith.addf %478, %494 : vector<16x32xf32>
    %cst_212 = arith.constant dense<0.000000e+00> : vector<32xf32>
    %496 = vector.multi_reduction <add>, %495, %cst_212 [0] : vector<16x32xf32> to vector<32xf32>
    %497 = vector.shape_cast %496 : vector<32xf32> to vector<1x32xf32>
    %cst_213 = arith.constant 1.600000e+01 : f32
    %498 = vector.broadcast %cst_213 : f32 to vector<1x32xf32>
    %499 = arith.divf %497, %498 : vector<1x32xf32>
    %500 = vector.broadcast %499 : vector<1x32xf32> to vector<16x32xf32>
    %501 = arith.subf %495, %500 : vector<16x32xf32>
    %502 = arith.mulf %501, %501 : vector<16x32xf32>
    %cst_214 = arith.constant dense<0.000000e+00> : vector<32xf32>
    %503 = vector.multi_reduction <add>, %502, %cst_214 [0] : vector<16x32xf32> to vector<32xf32>
    %504 = vector.shape_cast %503 : vector<32xf32> to vector<1x32xf32>
    %cst_215 = arith.constant 1.600000e+01 : f32
    %505 = vector.broadcast %cst_215 : f32 to vector<1x32xf32>
    %506 = arith.divf %504, %505 : vector<1x32xf32>
    %cst_216 = arith.constant 9.99999974E-6 : f32
    %507 = vector.broadcast %cst_216 : f32 to vector<1x32xf32>
    %508 = arith.addf %506, %507 : vector<1x32xf32>
    %509 = math.rsqrt %508 : vector<1x32xf32>
    %510 = vector.broadcast %509 : vector<1x32xf32> to vector<16x32xf32>
    %511 = arith.mulf %501, %510 : vector<16x32xf32>
    %c1_217 = arith.constant 1 : index
    %c0_218 = arith.constant 0 : index
    %c0_219 = arith.constant 0 : index
    %512 = vector.load %arg12[%c1_217, %c0_218, %c0_219] : memref<2x1x32xf32, #tpu.memory_space<vmem>>, vector<1x1x32xf32>
    %513 = vector.shape_cast %512 : vector<1x1x32xf32> to vector<1x32xf32>
    %514 = vector.broadcast %513 : vector<1x32xf32> to vector<16x32xf32>
    %515 = arith.mulf %511, %514 : vector<16x32xf32>
    %c1_220 = arith.constant 1 : index
    %c0_221 = arith.constant 0 : index
    %c0_222 = arith.constant 0 : index
    %516 = vector.load %arg13[%c1_220, %c0_221, %c0_222] : memref<2x1x32xf32, #tpu.memory_space<vmem>>, vector<1x1x32xf32>
    %517 = vector.shape_cast %516 : vector<1x1x32xf32> to vector<1x32xf32>
    %518 = vector.broadcast %517 : vector<1x32xf32> to vector<16x32xf32>
    %519 = arith.addf %515, %518 : vector<16x32xf32>
    %c0_223 = arith.constant 0 : index
    %c0_224 = arith.constant 0 : index
    %520 = vector.load %arg14[%c0_223, %c0_224] : memref<16x32xf32, #tpu.memory_space<vmem>>, vector<16x32xf32>
    tpu.vector_store %arg14[%c0_223, %c0_224], %519 {strides = array<i32>} : memref<16x32xf32, #tpu.memory_space<vmem>>, vector<16x32xf32>,
    %521 = vector.extract_strided_slice %519 {offsets = [0, 0], sizes = [8, 32], strides = [1, 1]} : vector<16x32xf32> to vector<8x32xf32>
    %cst_225 = arith.constant dense<0.000000e+00> : vector<32xf32>
    %522 = vector.multi_reduction <add>, %521, %cst_225 [0] : vector<8x32xf32> to vector<32xf32>
    %523 = vector.shape_cast %522 : vector<32xf32> to vector<1x32xf32>
    %cst_226 = arith.constant 1.250000e-01 : f32
    %524 = vector.broadcast %cst_226 : f32 to vector<1x32xf32>
    %525 = arith.mulf %524, %523 : vector<1x32xf32>
    %c0_227 = arith.constant 0 : index
    %c0_228 = arith.constant 0 : index
    %526 = vector.load %arg15[%c0_227, %c0_228] : memref<2x32xf32, #tpu.memory_space<vmem>>, vector<1x32xf32>
    tpu.vector_store %arg15[%c0_227, %c0_228], %525 {strides = array<i32>} : memref<2x32xf32, #tpu.memory_space<vmem>>, vector<1x32xf32>,
    %527 = vector.extract_strided_slice %519 {offsets = [8, 0], sizes = [8, 32], strides = [1, 1]} : vector<16x32xf32> to vector<8x32xf32>
    %cst_229 = arith.constant dense<0.000000e+00> : vector<32xf32>
    %528 = vector.multi_reduction <add>, %527, %cst_229 [0] : vector<8x32xf32> to vector<32xf32>
    %529 = vector.shape_cast %528 : vector<32xf32> to vector<1x32xf32>
    %cst_230 = arith.constant 1.250000e-01 : f32
    %530 = vector.broadcast %cst_230 : f32 to vector<1x32xf32>
    %531 = arith.mulf %530, %529 : vector<1x32xf32>
    %c1_231 = arith.constant 1 : index
    %c0_232 = arith.constant 0 : index
    %532 = vector.load %arg15[%c1_231, %c0_232] : memref<2x32xf32, #tpu.memory_space<vmem>>, vector<1x32xf32>
    tpu.vector_store %arg15[%c1_231, %c0_232], %531 {strides = array<i32>} : memref<2x32xf32, #tpu.memory_space<vmem>>, vector<1x32xf32>,
    return
  }
  func.func @transform_0(%arg0: i32) -> (i32, i32) {
    %c0_i32 = arith.constant 0 : i32
    %c0_i32_0 = arith.constant 0 : i32
    %c0_i32_1 = arith.constant 0 : i32
    return %c0_i32, %c0_i32_0 : i32, i32
  }
  func.func @transform_1(%arg0: i32) -> (i32, i32) {
    %c0_i32 = arith.constant 0 : i32
    %c0_i32_0 = arith.constant 0 : i32
    %c0_i32_1 = arith.constant 0 : i32
    return %c0_i32, %c0_i32_0 : i32, i32
  }
  func.func @transform_2(%arg0: i32) -> (i32, i32) {
    %c0_i32 = arith.constant 0 : i32
    %c0_i32_0 = arith.constant 0 : i32
    %c0_i32_1 = arith.constant 0 : i32
    return %c0_i32, %c0_i32_0 : i32, i32
  }
  func.func @transform_3(%arg0: i32) -> (i32, i32, i32) {
    %c0_i32 = arith.constant 0 : i32
    %c0_i32_0 = arith.constant 0 : i32
    %c0_i32_1 = arith.constant 0 : i32
    %c0_i32_2 = arith.constant 0 : i32
    return %c0_i32, %c0_i32_0, %c0_i32_1 : i32, i32, i32
  }
  func.func @transform_4(%arg0: i32) -> (i32, i32, i32) {
    %c0_i32 = arith.constant 0 : i32
    %c0_i32_0 = arith.constant 0 : i32
    %c0_i32_1 = arith.constant 0 : i32
    %c0_i32_2 = arith.constant 0 : i32
    return %c0_i32, %c0_i32_0, %c0_i32_1 : i32, i32, i32
  }
  func.func @transform_5(%arg0: i32) -> (i32, i32, i32) {
    %c0_i32 = arith.constant 0 : i32
    %c0_i32_0 = arith.constant 0 : i32
    %c0_i32_1 = arith.constant 0 : i32
    %c0_i32_2 = arith.constant 0 : i32
    return %c0_i32, %c0_i32_0, %c0_i32_1 : i32, i32, i32
  }
  func.func @transform_6(%arg0: i32) -> (i32, i32, i32) {
    %c0_i32 = arith.constant 0 : i32
    %c0_i32_0 = arith.constant 0 : i32
    %c0_i32_1 = arith.constant 0 : i32
    %c0_i32_2 = arith.constant 0 : i32
    return %c0_i32, %c0_i32_0, %c0_i32_1 : i32, i32, i32
  }
  func.func @transform_7(%arg0: i32) -> (i32, i32, i32) {
    %c0_i32 = arith.constant 0 : i32
    %c0_i32_0 = arith.constant 0 : i32
    %c0_i32_1 = arith.constant 0 : i32
    %c0_i32_2 = arith.constant 0 : i32
    return %c0_i32, %c0_i32_0, %c0_i32_1 : i32, i32, i32
  }
  func.func @transform_8(%arg0: i32) -> (i32, i32, i32) {
    %c0_i32 = arith.constant 0 : i32
    %c0_i32_0 = arith.constant 0 : i32
    %c0_i32_1 = arith.constant 0 : i32
    %c0_i32_2 = arith.constant 0 : i32
    return %c0_i32, %c0_i32_0, %c0_i32_1 : i32, i32, i32
  }
  func.func @transform_9(%arg0: i32) -> (i32, i32, i32) {
    %c0_i32 = arith.constant 0 : i32
    %c0_i32_0 = arith.constant 0 : i32
    %c0_i32_1 = arith.constant 0 : i32
    %c0_i32_2 = arith.constant 0 : i32
    return %c0_i32, %c0_i32_0, %c0_i32_1 : i32, i32, i32
  }
  func.func @transform_10(%arg0: i32) -> (i32, i32, i32) {
    %c0_i32 = arith.constant 0 : i32
    %c0_i32_0 = arith.constant 0 : i32
    %c0_i32_1 = arith.constant 0 : i32
    %c0_i32_2 = arith.constant 0 : i32
    return %c0_i32, %c0_i32_0, %c0_i32_1 : i32, i32, i32
  }
  func.func @transform_11(%arg0: i32) -> (i32, i32, i32) {
    %c0_i32 = arith.constant 0 : i32
    %c0_i32_0 = arith.constant 0 : i32
    %c0_i32_1 = arith.constant 0 : i32
    %c0_i32_2 = arith.constant 0 : i32
    return %c0_i32, %c0_i32_0, %c0_i32_1 : i32, i32, i32
  }
  func.func @transform_12(%arg0: i32) -> (i32, i32, i32) {
    %c0_i32 = arith.constant 0 : i32
    %c0_i32_0 = arith.constant 0 : i32
    %c0_i32_1 = arith.constant 0 : i32
    %c0_i32_2 = arith.constant 0 : i32
    return %c0_i32, %c0_i32_0, %c0_i32_1 : i32, i32, i32
  }
  func.func @transform_13(%arg0: i32) -> (i32, i32) {
    %c0_i32 = arith.constant 0 : i32
    %c0_i32_0 = arith.constant 0 : i32
    %c0_i32_1 = arith.constant 0 : i32
    return %c0_i32, %c0_i32_0 : i32, i32
  }
  func.func @transform_14(%arg0: i32) -> (i32, i32) {
    %c0_i32 = arith.constant 0 : i32
    %c0_i32_0 = arith.constant 0 : i32
    %c0_i32_1 = arith.constant 0 : i32
    return %c0_i32, %c0_i32_0 : i32, i32
  }
}

</mosaic_0001>

<bundles_post_ra>
// kernel: tpu_custom_call.1
= control target key start
LH: loop header
LB: loop body
LE: loop exit
PB: predicated region body
PF: predicated region fallthrough
CT: control target
= control target key end

     0   :  { %20 = vsyncpa [#allocation4], 0  ;;  %vm65_vm0 = vcmask 1041408   ;;  %vm58_vm1 = vcmask 15360   ;;  %s5214_s0 = inlined_call_operand.vmem [shape: f32[16,2], index: 0, kind: input, shape index: {}]   ;;  %s5215_s1 = inlined_call_operand.vmem [shape: f32[2,32], index: 1, kind: input, shape index: {}]   ;;  %s5216_s2 = inlined_call_operand.vmem [shape: f32[1,32], index: 2, kind: input, shape index: {}]   ;;  %s5217_s3 = inlined_call_operand.vmem [shape: f32[2,32,96], index: 3, kind: input, shape index: {}]   ;;  %s5218_s4 = inlined_call_operand.vmem [shape: f32[2,32,32], index: 4, kind: input, shape index: {}]   ;;  %s5219_s5 = inlined_call_operand.vmem [shape: f32[2,1,32], index: 5, kind: input, shape index: {}]   ;;  %s5220_s6 = inlined_call_operand.vmem [shape: f32[2,1,32], index: 6, kind: input, shape index: {}]   ;;  %s5221_s7 = inlined_call_operand.vmem [shape: f32[2,32,64], index: 7, kind: input, shape index: {}]   ;;  %s5222_s8 = inlined_call_operand.vmem [shape: f32[2,1,64], index: 8, kind: input, shape index: {}]   ;;  %s5223_s9 = inlined_call_operand.vmem [shape: f32[2,64,32], index: 9, kind: input, shape index: {}]   ;;  %s5224_s10 = inlined_call_operand.vmem [shape: f32[2,1,32], index: 10, kind: input, shape index: {}]   ;;  %s5225_s11 = inlined_call_operand.vmem [shape: f32[2,1,32], index: 11, kind: input, shape index: {}]   ;;  %s5226_s12 = inlined_call_operand.vmem [shape: f32[2,1,32], index: 12, kind: input, shape index: {}]   ;;  %s5227_s13 = inlined_call_operand.hbm [shape: f32[16,32], index: 13, kind: output, shape index: {0}]   ;;  %s5228_s14 = inlined_call_operand.hbm [shape: f32[2,32], index: 14, kind: output, shape index: {1}]  }
   0x1   :  { %v50_v0 = vld [vmem:[%s5215_s1] sm:$0x3]  ;;  %v49_v2 = vld [vmem:[%s5214_s0 + $0x8] sm:$0xff]  ;;  %v147_v3 = vld [vmem:[%s5217_s3 + $0x18] sm:$0xff] }
   0x2   :  { %v48_v1 = vld [vmem:[%s5214_s0] sm:$0xff]  ;;  %4121 = vmatprep.subr.msk.mxu0 %vm65_vm0, %v50_v0 }
   0x3   :  { %4123 = vmatprep.mubr.msk.f32.mxu0 %vm58_vm1, %v48_v1 }
   0x4   :  { %21 = vsyncpa [#allocation6], 0  ;;  %4122 = vmatpush3.msk.msra.mxu0 %vm65_vm0, %v50_v0  ;;  %v146_v4 = vld [vmem:[%s5217_s3 + $0x10] sm:$0xff]  ;;  %v145_v5 = vld [vmem:[%s5217_s3 + $0x8] sm:$0xff]  ;;  %vm148_vm2 = vcmask 261120   ;;  %v4525_v12 = vmov 0.0  }
   0x5   :  { %4124 = vmatmul.mubr.msk.f32.vlgmr.msra.gmra.mxu0 %vm58_vm1, %v49_v2  ;;  %4126 = vmatprep.subr.mxu0 %v147_v3  ;;  %v144_v6 = vld [vmem:[%s5217_s3] sm:$0xff]  ;;  %vm4526_vm3 = vmmov 0   ;;  %s4528_s27 = smov 96   ;;  %s4529_s28 = smov 80   ;;  %vm233_vm4 = vcmask 64512   ;;  %vm573_vm5 = vcmask 130112  }
   0x6   :  { %4127 = vmatpush3.msra.mxu0 %v147_v3  ;;  %v3892_v8 = vld [vmem:[%s5216_s2] ss:$0 sm:$0xff]  ;;  %4147 = vmatprep.subr.mxu1 %v4525_v12  ;;  %s4527_s2 = smov 120   ;;  %s4530_s29 = smov 88   ;;  %vm748_vm6 = vcmask 195712   ;;  %vm923_vm7 = vcmask 261312  }
   0x7   :  { %4128 = vmatprep.subr.mxu0 %v146_v4  ;;  %4149 = vmatprep.mubr.msk.f32.mxu1 %vm4526_vm3, %v4525_v12  ;;  %s4531_s30 = smov 72   ;;  %s4532_s15 = smov 112   ;;  %vm1861_vm8 = vcmask 523264  }
   0x8   :  { %4129 = vmatpush3.msra.mxu0 %v146_v4  ;;  %s4533_s16 = smov 104   ;;  %s4534_s17 = smov 64  }
   0x9   :  { %4130 = vmatprep.subr.mxu0 %v145_v5  ;;  %s5233_s18 = smov 48   ;;  %s5231_s19 = smov 56  }
   0xa   :  { %4131 = vmatpush3.msra.mxu0 %v145_v5  ;;  %s5229_s20 = smov 40   ;;  %s4538_s1 = smov 8  }
   0xb   :  { %4132 = vmatprep.subr.mxu0 %v144_v6  ;;  %s4539_s21 = smov 16   ;;  %s4540_s22 = smov 24  }
   0xc   :  { %4133 = vmatpush3.msra.mxu0 %v144_v6 }
   0xd   :  { %4137 = vmatprep.subr.mxu0 %v4525_v12 }
  0xc5   :  { %v4125_v7 = vpop.f32.mrf.mxu0 }
  0xc6   :  { %v4645_v11 = vadd.f32 %v4125_v7, %v3892_v8 }
  0xc7   :  { %v135_v9 = vpop.f32.mrf.mxu0 }
  0xc8   :  { %v4643_v10 = vadd.f32 %v3892_v8, %v135_v9 }
  0xca   :  { %4134 = vmatprep.mubr.msk.f32.mxu0 %vm148_vm2, %v4643_v10 }
  0xcb   :  { %4135 = vmatmul.mubr.msk.f32.vlgmr.msra.gmra.mxu0 %vm148_vm2, %v4645_v11 }
  0xcc   :  { %4139 = vmatprep.mubr.msk.f32.mxu0 %vm4526_vm3, %v4525_v12 }
 0x18b   :  { %v4657_v13 = vpop.f32.mrf.mxu0 }
 0x18d   :  { %v4659_v14 = vpop.f32.mrf.mxu0 }
 0x18e   :  { %400 = vrot.lane.b32.xlu1 %v4659_v14, %s4527_s2  ;;  %231 = vrot.lane.b32.xlu0 %v4659_v14, %s4528_s27 }
 0x192   :  { %577 = vrot.lane.b32.xlu1 %v4659_v14, %s4529_s28  ;;  %402 = vrot.lane.b32.xlu0 %v4659_v14, %s4530_s29 }
 0x196   :  { %752 = vrot.lane.b32.xlu1 %v4659_v14, %s4531_s30  ;;  %575 = vrot.lane.b32.xlu0 %v4659_v14, %s4532_s15 }
 0x19a   :  { %926 = vrot.lane.b32.xlu1 %v4657_v13, %s4528_s27  ;;  %750 = vrot.lane.b32.xlu0 %v4659_v14, %s4533_s16 }
 0x19e   :  { %1094 = vrot.lane.b32.xlu1 %v4657_v13, %s4527_s2  ;;  %1096 = vrot.lane.b32.xlu0 %v4657_v13, %s4530_s29 }
 0x1a2   :  { %1268 = vrot.lane.b32.xlu1 %v4657_v13, %s4532_s15  ;;  %1270 = vrot.lane.b32.xlu0 %v4657_v13, %s4529_s28 }
 0x1a6   :  { %1442 = vrot.lane.b32.xlu1 %v4657_v13, %s4533_s16  ;;  %1444 = vrot.lane.b32.xlu0 %v4657_v13, %s4531_s30 }
 0x1aa   :  { %323 = vrot.lane.b32.xlu1 %v4659_v14, %s4534_s17 }
 0x200   :  { %v401_v15 = vpop.permute.xlu1 %400  ;;  %v232_v16 = vpop.permute.xlu0 %231 }
 0x201   :  { %4138 = vmatpush3.xpose.msk.msra.mxu0 %vm233_vm4, %v232_v16 }
 0x202   :  { %4142 = vmatprep.subr.mxu0 %v4525_v12 }
 0x204   :  { %v578_v17 = vpop.permute.xlu1 %577  ;;  %4140 = vmatmul.mubr.msk.f32.vlgmr.msra.gmra.mxu0 %vm233_vm4, %v4659_v14  ;;  %v403_v18 = vpop.permute.xlu0 %402 }
 0x205   :  { %4148 = vmatpush3.xpose.msk.msra.mxu1 %vm233_vm4, %v403_v18  ;;  %4144 = vmatprep.mubr.msk.f32.mxu0 %vm4526_vm3, %v4525_v12 }
 0x206   :  { %4157 = vmatprep.subr.mxu1 %v4525_v12 }
 0x208   :  { %v753_v19 = vpop.permute.xlu1 %752  ;;  %4150 = vmatmul.mubr.msk.f32.vlgmr.msra.gmra.mxu1 %vm233_vm4, %v401_v15  ;;  %v576_v20 = vpop.permute.xlu0 %575 }
 0x209   :  { %4158 = vmatpush3.xpose.msk.msra.mxu1 %vm233_vm4, %v578_v17  ;;  %4159 = vmatprep.mubr.msk.f32.mxu1 %vm4526_vm3, %v4525_v12 }
 0x20a   :  { %4167 = vmatprep.subr.mxu1 %v4525_v12 }
 0x20c   :  { %v927_v21 = vpop.permute.xlu1 %926  ;;  %4160 = vmatmul.mubr.msk.f32.vlgmr.msra.gmra.mxu1 %vm233_vm4, %v576_v20  ;;  %v751_v22 = vpop.permute.xlu0 %750 }
 0x20d   :  { %4168 = vmatpush3.xpose.msk.msra.mxu1 %vm233_vm4, %v753_v19  ;;  %4169 = vmatprep.mubr.msk.f32.mxu1 %vm4526_vm3, %v4525_v12 }
 0x20e   :  { %4177 = vmatprep.subr.mxu1 %v4525_v12 }
 0x210   :  { %v1095_v23 = vpop.permute.xlu1 %1094  ;;  %4170 = vmatmul.mubr.msk.f32.vlgmr.msra.gmra.mxu1 %vm233_vm4, %v751_v22  ;;  %v1097_v24 = vpop.permute.xlu0 %1096 }
 0x211   :  { %4178 = vmatpush3.xpose.msk.msra.mxu1 %vm233_vm4, %v927_v21  ;;  %4179 = vmatprep.mubr.msk.f32.mxu1 %vm4526_vm3, %v4525_v12 }
 0x212   :  { %4187 = vmatprep.subr.mxu1 %v4525_v12 }
 0x214   :  { %v1269_v25 = vpop.permute.xlu1 %1268  ;;  %4180 = vmatmul.mubr.msk.f32.vlgmr.msra.gmra.mxu1 %vm233_vm4, %v4657_v13  ;;  %v1271_v26 = vpop.permute.xlu0 %1270 }
 0x215   :  { %4188 = vmatpush3.xpose.msk.msra.mxu1 %vm233_vm4, %v1097_v24  ;;  %4189 = vmatprep.mubr.msk.f32.mxu1 %vm4526_vm3, %v4525_v12 }
 0x216   :  { %4197 = vmatprep.subr.mxu1 %v4525_v12 }
 0x218   :  { %v1443_v27 = vpop.permute.xlu1 %1442  ;;  %4190 = vmatmul.mubr.msk.f32.vlgmr.msra.gmra.mxu1 %vm233_vm4, %v1095_v23  ;;  %v1445_v28 = vpop.permute.xlu0 %1444 }
 0x219   :  { %4198 = vmatpush3.xpose.msk.msra.mxu1 %vm233_vm4, %v1271_v26  ;;  %4199 = vmatprep.mubr.msk.f32.mxu1 %vm4526_vm3, %v4525_v12 }
 0x21a   :  { %4207 = vmatprep.subr.mxu1 %v4525_v12 }
 0x21c   :  { %v324_v29 = vpop.permute.xlu1 %323  ;;  %4200 = vmatmul.mubr.msk.f32.vlgmr.msra.gmra.mxu1 %vm233_vm4, %v1269_v25 }
 0x21d   :  { %4143 = vmatpush3.msra.mxu0 %v324_v29  ;;  %4208 = vmatpush3.xpose.msk.msra.mxu1 %vm233_vm4, %v1445_v28 }
 0x21e   :  { %4209 = vmatprep.mubr.msk.f32.mxu1 %vm4526_vm3, %v4525_v12  ;;  %4152 = vmatprep.subr.mxu0 %v4525_v12 }
 0x220   :  { %4210 = vmatmul.mubr.msk.f32.vlgmr.msra.gmra.mxu1 %vm233_vm4, %v1443_v27 }
 0x2c4   :  { %v304_v30 = vpop.f32.mrf.mxu0 }
 0x2c5   :  { %v308_v31 = vmul.f32 0.35355338, %v304_v30 }
 0x2c6   :  { %v4141_v32 = vpop.f32.mrf.mxu0 }
 0x2c7   :  { %v309_v33 = vsel %vm233_vm4, %v308_v31, -inf }
 0x2c8   :  { %310 = vmax.xlane.f32.xlu0 %v309_v33  ;;  %v474_v34 = vpop.f32.mrf.mxu1 }
 0x2c9   :  { %v478_v35 = vmul.f32 0.35355338, %v474_v34 }
 0x2ca   :  { %v4151_v36 = vpop.f32.mrf.mxu1 }
 0x2cb   :  { %v479_v37 = vsel %vm233_vm4, %v478_v35, -inf }
 0x2cc   :  { %480 = vmax.xlane.f32.xlu1 %v479_v37  ;;  %v649_v38 = vpop.f32.mrf.mxu1 }
 0x2cd   :  { %v653_v39 = vmul.f32 0.35355338, %v649_v38 }
 0x2ce   :  { %v4161_v40 = vpop.f32.mrf.mxu1 }
 0x2cf   :  { %v654_v41 = vsel %vm233_vm4, %v653_v39, -inf }
 0x2d0   :  { %655 = vmax.xlane.f32.xlu0 %v654_v41  ;;  %v824_v42 = vpop.f32.mrf.mxu1 }
 0x2d1   :  { %v828_v43 = vmul.f32 0.35355338, %v824_v42 }
 0x2d2   :  { %v4171_v44 = vpop.f32.mrf.mxu1 }
 0x2d3   :  { %v829_v45 = vsel %vm233_vm4, %v828_v43, -inf }
 0x2d4   :  { %830 = vmax.xlane.f32.xlu0 %v829_v45  ;;  %v998_v46 = vpop.f32.mrf.mxu1 }
 0x2d5   :  { %v4735_v47 = vmul.f32 0.35355338, %v998_v46 }
 0x2d6   :  { %v4181_v48 = vpop.f32.mrf.mxu1 }
 0x2d7   :  { %v1003_v49 = vsel %vm233_vm4, %v4735_v47, -inf }
 0x2d8   :  { %1004 = vmax.xlane.f32.xlu1 %v1003_v49  ;;  %v1168_v50 = vpop.f32.mrf.mxu1 }
 0x2d9   :  { %v1172_v51 = vmul.f32 0.35355338, %v1168_v50 }
 0x2da   :  { %v4191_v52 = vpop.f32.mrf.mxu1 }
 0x2db   :  { %v1173_v53 = vsel %vm233_vm4, %v1172_v51, -inf }
 0x2dc   :  { %1174 = vmax.xlane.f32.xlu0 %v1173_v53  ;;  %v1342_v54 = vpop.f32.mrf.mxu1 }
 0x2dd   :  { %v1346_v55 = vmul.f32 0.35355338, %v1342_v54 }
 0x2de   :  { %v4201_v56 = vpop.f32.mrf.mxu1 }
 0x2df   :  { %v1347_v57 = vsel %vm233_vm4, %v1346_v55, -inf }
 0x2e0   :  { %1348 = vmax.xlane.f32.xlu1 %v1347_v57  ;;  %v1516_v58 = vpop.f32.mrf.mxu1 }
 0x2e1   :  { %v1520_v59 = vmul.f32 0.35355338, %v1516_v58 }
 0x2e2   :  { %v4211_v60 = vpop.f32.mrf.mxu1 }
 0x2e3   :  { %v1521_v61 = vsel %vm233_vm4, %v1520_v59, -inf }
 0x2e4   :  { %1522 = vmax.xlane.f32.xlu0 %v1521_v61 }
 0x2f1   :  { %668 = vrot.lane.b32.xlu1 %v4659_v14, %s5233_s18 }
 0x2fa   :  { %493 = vrot.lane.b32.xlu0 %v4659_v14, %s5231_s19 }
 0x351   :  { %v311_v62 = vpop.xlane.xlu0 %310 }
 0x352   :  { %v312_v63 = vsub.f32 %v308_v31, %v311_v62 }
 0x354   :  { %v313_v0 = vmul.f32 1.442695, %v312_v63 }
 0x355   :  { %v481_v1 = vpop.xlane.xlu1 %480 }
 0x356   :  { %4409 = vpow2.f32 %v313_v0  ;;  %v482_v2 = vsub.f32 %v478_v35, %v481_v1 }
 0x358   :  { %v483_v3 = vmul.f32 1.442695, %v482_v2 }
 0x359   :  { %v656_v4 = vpop.xlane.xlu0 %655 }
 0x35a   :  { %4411 = vpow2.f32 %v483_v3  ;;  %v657_v5 = vsub.f32 %v653_v39, %v656_v4 }
 0x35c   :  { %v658_v6 = vmul.f32 1.442695, %v657_v5 }
 0x35d   :  { %v831_v7 = vpop.xlane.xlu0 %830 }
 0x35e   :  { %4413 = vpow2.f32 %v658_v6  ;;  %v832_v8 = vsub.f32 %v828_v43, %v831_v7 }
 0x360   :  { %v833_v9 = vmul.f32 1.442695, %v832_v8 }
 0x361   :  { %v1005_v28 = vpop.xlane.xlu1 %1004 }
 0x362   :  { %4415 = vpow2.f32 %v833_v9  ;;  %v1006_v29 = vsub.f32 %v4735_v47, %v1005_v28 }
 0x363   :  { %v4410_v15 = vpop.eup %4409 }
 0x364   :  { %v315_v16 = vsel %vm233_vm4, %v4410_v15, 0.0  ;;  %v1007_v31 = vmul.f32 1.442695, %v1006_v29 }
 0x365   :  { %316 = vadd.xlane.f32.xlu1 %v315_v16  ;;  %v1175_v17 = vpop.xlane.xlu0 %1174 }
 0x366   :  { %v1176_v18 = vsub.f32 %v1172_v51, %v1175_v17 }
 0x367   :  { %v4747_v19 = vpop.eup %4411 }
 0x368   :  { %v1177_v20 = vmul.f32 1.442695, %v1176_v18  ;;  %v485_v21 = vsel %vm233_vm4, %v4747_v19, 0.0 }
 0x369   :  { %486 = vadd.xlane.f32.xlu0 %v485_v21  ;;  %v1349_v30 = vpop.xlane.xlu1 %1348 }
 0x36a   :  { %4417 = vpow2.f32 %v1177_v20  ;;  %v1350_v32 = vsub.f32 %v1346_v55, %v1349_v30 }
 0x36b   :  { %v4751_v22 = vpop.eup %4413  ;;  %4419 = vpow2.f32 %v1007_v31 }
 0x36c   :  { %v660_v23 = vsel %vm233_vm4, %v4751_v22, 0.0  ;;  %v1351_v33 = vmul.f32 1.442695, %v1350_v32 }
 0x36d   :  { %661 = vadd.xlane.f32.xlu1 %v660_v23  ;;  %v1523_v34 = vpop.xlane.xlu0 %1522  ;;  %v669_v42 = vpop.permute.xlu1 %668 }
 0x36e   :  { %4421 = vpow2.f32 %v1351_v33  ;;  %v1524_v35 = vsub.f32 %v1520_v59, %v1523_v34 }
 0x36f   :  { %v4755_v24 = vpop.eup %4415 }
 0x370   :  { %v835_v25 = vsel %vm233_vm4, %v4755_v24, 0.0  ;;  %v1525_v36 = vmul.f32 1.442695, %v1524_v35 }
 0x371   :  { %836 = vadd.xlane.f32.xlu0 %v835_v25  ;;  %v494_v43 = vpop.permute.xlu0 %493 }
 0x372   :  { %4423 = vpow2.f32 %v1525_v36 }
 0x377   :  { %v4759_v26 = vpop.eup %4417 }
 0x378   :  { %v1179_v27 = vsel %vm233_vm4, %v4759_v26, 0.0  ;;  %v4768_v37 = vpop.eup %4419 }
 0x379   :  { %1180 = vadd.xlane.f32.xlu0 %v1179_v27 }
 0x37b   :  { %v4772_v38 = vpop.eup %4421 }
 0x37c   :  { %v1353_v39 = vsel %vm233_vm4, %v4772_v38, 0.0 }
 0x37e   :  { %843 = vrot.lane.b32.xlu1 %v4659_v14, %s5229_s20  ;;  %v1009_v14 = vsel %vm233_vm4, %v4768_v37, 0.0 }
 0x37f   :  { %v4776_v40 = vpop.eup %4423 }
 0x380   :  { %v1527_v41 = vsel %vm233_vm4, %v4776_v40, 0.0 }
 0x38f   :  { %1017 = vrot.lane.b32.xlu0 %v4657_v13, %s4534_s17 }
 0x3a2   :  { %1010 = vadd.xlane.f32.xlu1 %v1009_v14 }
 0x3a6   :  { %1354 = vadd.xlane.f32.xlu1 %v1353_v39 }
 0x3ae   :  { %1528 = vadd.xlane.f32.xlu0 %v1527_v41 }
 0x3b7   :  { %1187 = vrot.lane.b32.xlu1 %v4657_v13, %s5231_s19 }
 0x3bb   :  { %1535 = vrot.lane.b32.xlu1 %v4657_v13, %s5229_s20 }
 0x3c4   :  { %1361 = vrot.lane.b32.xlu0 %v4657_v13, %s5233_s18 }
 0x3ee   :  { %v317_v44 = vpop.xlane.xlu1 %316 }
 0x3ef   :  { %4425 = vrcp.f32 %v317_v44 }
 0x3f2   :  { %v487_v45 = vpop.xlane.xlu0 %486 }
 0x3f3   :  { %4427 = vrcp.f32 %v487_v45 }
 0x3f6   :  { %v662_v46 = vpop.xlane.xlu1 %661 }
 0x3f7   :  { %4429 = vrcp.f32 %v662_v46 }
 0x3fa   :  { %v837_v47 = vpop.xlane.xlu0 %836  ;;  %v844_v2 = vpop.permute.xlu1 %843 }
 0x3fb   :  { %4431 = vrcp.f32 %v837_v47 }
 0x3fc   :  { %v4426_v48 = vpop.eup %4425 }
 0x3fd   :  { %v319_v49 = vmul.f32 %v4426_v48, %v317_v44 }
 0x3ff   :  { %v320_v50 = vsub.f32 2.0, %v319_v49 }
 0x400   :  { %v4428_v51 = vpop.eup %4427 }
 0x401   :  { %v321_v52 = vmul.f32 %v4426_v48, %v320_v50  ;;  %v489_v53 = vmul.f32 %v4428_v51, %v487_v45  ;;  %v1621_v45 = vld [vmem:[%s5218_s4 + $0x18] sm:$0xff]  ;;  %v1619_v48 = vld [vmem:[%s5218_s4 + $0x8] sm:$0xff]  ;;  %v1618_v50 = vld [vmem:[%s5218_s4] sm:$0xff] }
 0x402   :  { %v1181_v1 = vpop.xlane.xlu0 %1180  ;;  %4217 = vmatprep.subr.mxu1 %v1621_v45 }
 0x403   :  { %v322_v54 = vmul.f32 %v4410_v15, %v321_v52  ;;  %v490_v55 = vsub.f32 2.0, %v489_v53  ;;  %4433 = vrcp.f32 %v1181_v1  ;;  %4218 = vmatpush3.msra.mxu1 %v1621_v45 }
 0x404   :  { %v4430_v56 = vpop.eup %4429 }
 0x405   :  { %v491_v13 = vmul.f32 %v4428_v51, %v490_v55  ;;  %v664_v57 = vmul.f32 %v4430_v56, %v662_v46  ;;  %4145 = vmatmul.mubr.msk.f32.vlgmr.msra.gmra.mxu0 %vm233_vm4, %v322_v54  ;;  %v1620_v46 = vld [vmem:[%s5218_s4 + $0x10] sm:$0xff] }
 0x406   :  { %4153 = vmatpush3.msra.mxu0 %v494_v43  ;;  %4154 = vmatprep.mubr.msk.f32.mxu0 %vm4526_vm3, %v4525_v12  ;;  %v1018_v5 = vpop.permute.xlu0 %1017 }
 0x407   :  { %v492_v58 = vmul.f32 %v4747_v19, %v491_v13  ;;  %v665_v59 = vsub.f32 2.0, %v664_v57  ;;  %4162 = vmatprep.subr.mxu0 %v4525_v12  ;;  %4219 = vmatprep.subr.mxu1 %v1620_v46 }
 0x408   :  { %v4432_v60 = vpop.eup %4431  ;;  %4220 = vmatpush3.msra.mxu1 %v1620_v46 }
 0x409   :  { %v666_v61 = vmul.f32 %v4430_v56, %v665_v59  ;;  %v839_v62 = vmul.f32 %v4432_v60, %v837_v47  ;;  %4155 = vmatmul.mubr.msk.f32.vlgmr.msra.gmra.mxu0 %vm233_vm4, %v492_v58  ;;  %4221 = vmatprep.subr.mxu1 %v1619_v48 }
 0x40a   :  { %4163 = vmatpush3.msra.mxu0 %v669_v42  ;;  %4164 = vmatprep.mubr.msk.f32.mxu0 %vm4526_vm3, %v4525_v12 }
 0x40b   :  { %v667_v63 = vmul.f32 %v4751_v22, %v666_v61  ;;  %v840_v0 = vsub.f32 2.0, %v839_v62  ;;  %4172 = vmatprep.subr.mxu0 %v4525_v12  ;;  %4222 = vmatpush3.msra.mxu1 %v1619_v48  ;;  %v1848_v48 = vld [vmem:[%s5223_s9 + $0x10] sm:$0xff] }
 0x40c   :  { %4223 = vmatprep.subr.mxu1 %v1618_v50 }
 0x40d   :  { %v841_v3 = vmul.f32 %v4432_v60, %v840_v0  ;;  %4165 = vmatmul.mubr.msk.f32.vlgmr.msra.gmra.mxu0 %vm233_vm4, %v667_v63  ;;  %4224 = vmatpush3.msra.mxu1 %v1618_v50  ;;  %v1755_v63 = vld [vmem:[%s5221_s7 + $0x18] sm:$0xff]  ;;  %v1754_v0 = vld [vmem:[%s5221_s7 + $0x10] sm:$0xff]  ;;  %v1846_v50 = vld [vmem:[%s5223_s9] sm:$0xff] }
 0x40e   :  { %4173 = vmatpush3.msra.mxu0 %v844_v2  ;;  %4174 = vmatprep.mubr.msk.f32.mxu0 %vm4526_vm3, %v4525_v12  ;;  %v1752_v2 = vld [vmem:[%s5221_s7] sm:$0xff] }
 0x40f   :  { %v842_v4 = vmul.f32 %v4755_v24, %v841_v3  ;;  %4182 = vmatprep.subr.mxu0 %v4525_v12  ;;  %v1853_v3 = vld [vmem:[%s5223_s9 + $0x38] sm:$0xff] }
 0x410   :  { %v4434_v8 = vpop.eup %4433  ;;  %4239 = vmatprep.subr.mxu1 %v1853_v3 }
 0x411   :  { %4175 = vmatmul.mubr.msk.f32.vlgmr.msra.gmra.mxu0 %vm233_vm4, %v842_v4  ;;  %v1183_v15 = vmul.f32 %v4434_v8, %v1181_v1  ;;  %v1753_v1 = vld [vmem:[%s5221_s7 + $0x8] sm:$0xff]  ;;  %v1852_v4 = vld [vmem:[%s5223_s9 + $0x30] sm:$0xff] }
 0x412   :  { %4183 = vmatpush3.msra.mxu0 %v1018_v5  ;;  %4184 = vmatprep.mubr.msk.f32.mxu0 %vm4526_vm3, %v4525_v12  ;;  %v1851_v5 = vld [vmem:[%s5223_s9 + $0x28] sm:$0xff] }
 0x413   :  { %4192 = vmatprep.subr.mxu0 %v4525_v12  ;;  %v1184_v18 = vsub.f32 2.0, %v1183_v15 }
 0x415   :  { %v1185_v23 = vmul.f32 %v4434_v8, %v1184_v18 }
 0x417   :  { %v1186_v28 = vmul.f32 %v4759_v26, %v1185_v23 }
 0x42b   :  { %v1011_v6 = vpop.xlane.xlu1 %1010 }
 0x42c   :  { %4435 = vrcp.f32 %v1011_v6 }
 0x42f   :  { %v1355_v7 = vpop.xlane.xlu1 %1354 }
 0x430   :  { %4437 = vrcp.f32 %v1355_v7 }
 0x433   :  { %v1188_v27 = vpop.permute.xlu1 %1187 }
 0x437   :  { %v1529_v9 = vpop.xlane.xlu0 %1528  ;;  %v1536_v35 = vpop.permute.xlu1 %1535 }
 0x438   :  { %4439 = vrcp.f32 %v1529_v9 }
 0x439   :  { %v4436_v16 = vpop.eup %4435 }
 0x43a   :  { %v1013_v17 = vmul.f32 %v4436_v16, %v1011_v6  ;;  %v1850_v6 = vld [vmem:[%s5223_s9 + $0x20] sm:$0xff] }
 0x43b   :  { %v1362_v32 = vpop.permute.xlu0 %1361 }
 0x43c   :  { %v1014_v19 = vsub.f32 2.0, %v1013_v17 }
 0x43d   :  { %v4438_v20 = vpop.eup %4437 }
 0x43e   :  { %v1015_v21 = vmul.f32 %v4436_v16, %v1014_v19  ;;  %v1357_v22 = vmul.f32 %v4438_v20, %v1355_v7 }
 0x440   :  { %v1016_v24 = vmul.f32 %v4768_v37, %v1015_v21  ;;  %v1358_v25 = vsub.f32 2.0, %v1357_v22 }
 0x442   :  { %4185 = vmatmul.mubr.msk.f32.vlgmr.msra.gmra.mxu0 %vm233_vm4, %v1016_v24  ;;  %v1359_v29 = vmul.f32 %v4438_v20, %v1358_v25 }
 0x443   :  { %4193 = vmatpush3.msra.mxu0 %v1188_v27  ;;  %4194 = vmatprep.mubr.msk.f32.mxu0 %vm4526_vm3, %v4525_v12 }
 0x444   :  { %4202 = vmatprep.subr.mxu0 %v4525_v12  ;;  %v1360_v33 = vmul.f32 %v4772_v38, %v1359_v29 }
 0x445   :  { %v4440_v30 = vpop.eup %4439 }
 0x446   :  { %v1531_v31 = vmul.f32 %v4440_v30, %v1529_v9  ;;  %4195 = vmatmul.mubr.msk.f32.vlgmr.msra.gmra.mxu0 %vm233_vm4, %v1186_v28 }
 0x447   :  { %4203 = vmatpush3.msra.mxu0 %v1362_v32  ;;  %4204 = vmatprep.mubr.msk.f32.mxu0 %vm4526_vm3, %v4525_v12 }
 0x448   :  { %v1532_v34 = vsub.f32 2.0, %v1531_v31  ;;  %4212 = vmatprep.subr.mxu0 %v4525_v12 }
 0x44a   :  { %v1533_v36 = vmul.f32 %v4440_v30, %v1532_v34  ;;  %4205 = vmatmul.mubr.msk.f32.vlgmr.msra.gmra.mxu0 %vm233_vm4, %v1360_v33 }
 0x44b   :  { %4213 = vmatpush3.msra.mxu0 %v1536_v35  ;;  %4214 = vmatprep.mubr.msk.f32.mxu0 %vm4526_vm3, %v4525_v12 }
 0x44c   :  { %v1534_v26 = vmul.f32 %v4776_v40, %v1533_v36  ;;  %4228 = vmatprep.subr.mxu0 %v1755_v63 }
 0x44e   :  { %4215 = vmatmul.mubr.msk.f32.vlgmr.msra.gmra.mxu0 %vm233_vm4, %v1534_v26 }
 0x44f   :  { %4229 = vmatpush3.msra.mxu0 %v1755_v63 }
 0x450   :  { %4230 = vmatprep.subr.mxu0 %v1754_v0 }
 0x451   :  { %4231 = vmatpush3.msra.mxu0 %v1754_v0 }
 0x452   :  { %4232 = vmatprep.subr.mxu0 %v1753_v1 }
 0x453   :  { %4233 = vmatpush3.msra.mxu0 %v1753_v1 }
 0x454   :  { %4234 = vmatprep.subr.mxu0 %v1752_v2 }
 0x455   :  { %4235 = vmatpush3.msra.mxu0 %v1752_v2 }
 0x4c5   :  { %v395_v37 = vpop.f32.mrf.mxu0 }
 0x4c6   :  { %399 = vst.msk [vmem:[#allocation2] sm:$0xff] %vm233_vm4, %v395_v37 }
 0x4c7   :  { %v4146_v14 = vpop.f32.mrf.mxu0 }
 0x4c9   :  { %v565_v38 = vpop.f32.mrf.mxu0 }
 0x4ca   :  { %570 = vrot.lane.b32.xlu0 %v565_v38, %s4538_s1 }
 0x4cb   :  { %v4156_v39 = vpop.f32.mrf.mxu0 }
 0x4cc   :  { %v3924_v39 = vld [vmem:[%s5219_s5] ss:$0 sm:$0xff] }
 0x4cd   :  { %v740_v41 = vpop.f32.mrf.mxu0 }
 0x4ce   :  { %745 = vrot.lane.b32.xlu1 %v740_v41, %s4539_s21 }
 0x4cf   :  { %v4166_v42 = vpop.f32.mrf.mxu0 }
 0x4d1   :  { %v915_v43 = vpop.f32.mrf.mxu0 }
 0x4d2   :  { %920 = vrot.lane.b32.xlu1 %v915_v43, %s4540_s22  ;;  %v3925_v43 = vld [vmem:[%s5220_s6] ss:$0 sm:$0xff] }
 0x4d3   :  { %v4176_v40 = vpop.f32.mrf.mxu0 }
 0x502   :  { %v1089_v44 = vpop.f32.mrf.mxu0 }
 0x503   :  { %1093 = vst.msk [vmem:[#allocation2 + $0x8] sm:$0xff] %vm233_vm4, %v1089_v44 }
 0x504   :  { %v4186_v47 = vpop.f32.mrf.mxu0 }
 0x505   :  { %v1849_v47 = vld [vmem:[%s5223_s9 + $0x18] sm:$0xff] }
 0x506   :  { %v1259_v49 = vpop.f32.mrf.mxu0 }
 0x507   :  { %1264 = vrot.lane.b32.xlu0 %v1259_v49, %s4538_s1  ;;  %v1847_v49 = vld [vmem:[%s5223_s9 + $0x8] sm:$0xff] }
 0x508   :  { %v4196_v51 = vpop.f32.mrf.mxu0 }
 0x509   :  { %v3926_v51 = vld [vmem:[%s5222_s8] ss:$0 sm:$0xff] }
 0x50a   :  { %v1433_v52 = vpop.f32.mrf.mxu0 }
 0x50b   :  { %1438 = vrot.lane.b32.xlu0 %v1433_v52, %s4539_s21 }
 0x50c   :  { %v4206_v53 = vpop.f32.mrf.mxu0 }
 0x50e   :  { %v1607_v54 = vpop.f32.mrf.mxu0 }
 0x50f   :  { %1612 = vrot.lane.b32.xlu1 %v1607_v54, %s4540_s22 }
 0x510   :  { %v4216_v55 = vpop.f32.mrf.mxu0 }
 0x53c   :  { %v571_v56 = vpop.permute.xlu0 %570 }
 0x53d   :  { %574 = vst.msk [vmem:[#allocation2] sm:$0xff] %vm573_vm5, %v571_v56 }
 0x540   :  { %v746_v13 = vpop.permute.xlu1 %745 }
 0x541   :  { %749 = vst.msk [vmem:[#allocation2] sm:$0xff] %vm748_vm6, %v746_v13 }
 0x544   :  { %v921_v57 = vpop.permute.xlu1 %920 }
 0x545   :  { %924 = vst.msk [vmem:[#allocation2] sm:$0xff] %vm923_vm7, %v921_v57  ;;  %v3937_v57 = vld [vmem:[%s5217_s3 + $0x38] sm:$0xff] }
 0x546   :  { %4258 = vmatprep.subr.mxu0 %v3937_v57 }
 0x54c   :  { %v1616_v58 = vld [vmem:[#allocation2] sm:$0xff] }
 0x54d   :  { %4225 = vmatprep.mubr.msk.f32.mxu1 %vm148_vm2, %v1616_v58  ;;  %v3936_v58 = vld [vmem:[%s5217_s3 + $0x30] sm:$0xff] }
 0x579   :  { %v1265_v59 = vpop.permute.xlu0 %1264 }
 0x57a   :  { %1267 = vst.msk [vmem:[#allocation2 + $0x8] sm:$0xff] %vm573_vm5, %v1265_v59  ;;  %v3935_v59 = vld [vmem:[%s5217_s3 + $0x28] sm:$0xff] }
 0x57d   :  { %v1439_v60 = vpop.permute.xlu0 %1438 }
 0x57e   :  { %1441 = vst.msk [vmem:[#allocation2 + $0x8] sm:$0xff] %vm748_vm6, %v1439_v60  ;;  %v3934_v60 = vld [vmem:[%s5217_s3 + $0x20] sm:$0xff] }
 0x581   :  { %v1613_v61 = vpop.permute.xlu1 %1612 }
 0x582   :  { %1615 = vst.msk [vmem:[#allocation2 + $0x8] sm:$0xff] %vm923_vm7, %v1613_v61  ;;  %v3929_v61 = vld [vmem:[%s5224_s10] ss:$0 sm:$0xff] }
 0x589   :  { %v1617_v62 = vld [vmem:[#allocation2 + $0x8] sm:$0xff] }
 0x58a   :  { %4226 = vmatmul.mubr.msk.f32.vlgmr.msra.gmra.mxu1 %vm148_vm2, %v1617_v62 }
 0x58b   :  { %4240 = vmatpush3.msra.mxu1 %v1853_v3 }
 0x58c   :  { %4241 = vmatprep.subr.mxu1 %v1852_v4 }
 0x58d   :  { %4242 = vmatpush3.msra.mxu1 %v1852_v4 }
 0x58e   :  { %4243 = vmatprep.subr.mxu1 %v1851_v5 }
 0x58f   :  { %4244 = vmatpush3.msra.mxu1 %v1851_v5 }
 0x590   :  { %4245 = vmatprep.subr.mxu1 %v1850_v6 }
 0x591   :  { %4246 = vmatpush3.msra.mxu1 %v1850_v6 }
 0x592   :  { %4247 = vmatprep.subr.mxu1 %v1849_v47 }
 0x593   :  { %4248 = vmatpush3.msra.mxu1 %v1849_v47 }
 0x594   :  { %4249 = vmatprep.subr.mxu1 %v1848_v48 }
 0x595   :  { %4250 = vmatpush3.msra.mxu1 %v1848_v48 }
 0x596   :  { %4251 = vmatprep.subr.mxu1 %v1847_v49 }
 0x597   :  { %4252 = vmatpush3.msra.mxu1 %v1847_v49 }
 0x598   :  { %4253 = vmatprep.subr.mxu1 %v1846_v50 }
 0x599   :  { %4254 = vmatpush3.msra.mxu1 %v1846_v50 }
 0x59a   :  { %4279 = vmatprep.subr.mxu1 %v4525_v12 }
 0x64a   :  { %v4227_v7 = vpop.f32.mrf.mxu1 }
 0x64b   :  { %v1704_v8 = vadd.f32 %v4227_v7, %v4645_v11 }
 0x64c   :  { %v1694_v9 = vpop.f32.mrf.mxu1 }
 0x64d   :  { %v1703_v15 = vadd.f32 %v1694_v9, %v4643_v10  ;;  %v1706_v16 = vsel %vm148_vm2, %v1704_v8, 0.0 }
 0x64f   :  { %v1705_v17 = vsel %vm148_vm2, %v1703_v15, 0.0 }
 0x650   :  { %v1707_v18 = vadd.f32 %v1706_v16, %v1705_v17 }
 0x652   :  { %v1708_v19 = vrot.slane %v1707_v18, 4 }
 0x654   :  { %v1709_v20 = vadd.f32 %v1708_v19, %v1707_v18 }
 0x656   :  { %v1710_v21 = vrot.slane %v1709_v20, 2 }
 0x658   :  { %v1711_v22 = vadd.f32 %v1710_v21, %v1709_v20 }
 0x65a   :  { %v1712_v23 = vrot.slane %v1711_v22, 1 }
 0x65c   :  { %v1713_v24 = vadd.f32 %v1712_v23, %v1711_v22 }
 0x65e   :  { %v1715_v25 = vmul.f32 0.0625, %v1713_v24 }
 0x660   :  { %v1716_v27 = vsub.f32 %v1703_v15, %v1715_v25  ;;  %v1717_v28 = vsub.f32 %v1704_v8, %v1715_v25 }
 0x662   :  { %v1718_v29 = vmul.f32 %v1716_v27, %v1716_v27  ;;  %v1719_v30 = vmul.f32 %v1717_v28, %v1717_v28 }
 0x664   :  { %v1720_v11 = vsel %vm148_vm2, %v1718_v29, 0.0  ;;  %v1721_v10 = vsel %vm148_vm2, %v1719_v30, 0.0 }
 0x665   :  { %v1722_v31 = vadd.f32 %v1721_v10, %v1720_v11 }
 0x667   :  { %v1723_v32 = vrot.slane %v1722_v31, 4 }
 0x669   :  { %v1724_v33 = vadd.f32 %v1723_v32, %v1722_v31 }
 0x66b   :  { %v1725_v34 = vrot.slane %v1724_v33, 2 }
 0x66d   :  { %v1726_v35 = vadd.f32 %v1725_v34, %v1724_v33  ;;  %v3932_v34 = vld [vmem:[%s5225_s11] ss:$0 sm:$0xff] }
 0x66f   :  { %v1727_v36 = vrot.slane %v1726_v35, 1 }
 0x671   :  { %v1728_v26 = vadd.f32 %v1727_v36, %v1726_v35 }
 0x673   :  { %v1729_v37 = vmul.f32 0.0625, %v1728_v26  ;;  %v3933_v26 = vld [vmem:[%s5226_s12] ss:$0 sm:$0xff] }
 0x675   :  { %v1730_v14 = vadd.f32 1e-05, %v1729_v37 }
 0x677   :  { %4441 = vrsqrt.f32 %v1730_v14 }
 0x684   :  { %v4442_v38 = vpop.eup %4441 }
 0x685   :  { %v1732_v41 = vmul.f32 %v4442_v38, %v1716_v27  ;;  %v1733_v42 = vmul.f32 %v4442_v38, %v1717_v28 }
 0x687   :  { %v1741_v40 = vmul.f32 %v3924_v39, %v1732_v41  ;;  %v1742_v44 = vmul.f32 %v3924_v39, %v1733_v42 }
 0x689   :  { %v1750_v45 = vadd.f32 %v3925_v43, %v1741_v40  ;;  %v1751_v46 = vadd.f32 %v3925_v43, %v1742_v44 }
 0x68b   :  { %4236 = vmatprep.mubr.msk.f32.mxu0 %vm148_vm2, %v1750_v45 }
 0x68c   :  { %4237 = vmatmul.mubr.msk.f32.vlgmr.msra.gmra.mxu0 %vm148_vm2, %v1751_v46 }
 0x68d   :  { %4259 = vmatpush3.msra.mxu0 %v3937_v57 }
 0x68e   :  { %4260 = vmatprep.subr.mxu0 %v3936_v58 }
 0x68f   :  { %4261 = vmatpush3.msra.mxu0 %v3936_v58 }
 0x690   :  { %4262 = vmatprep.subr.mxu0 %v3935_v59 }
 0x691   :  { %4263 = vmatpush3.msra.mxu0 %v3935_v59 }
 0x692   :  { %4264 = vmatprep.subr.mxu0 %v3934_v60 }
 0x693   :  { %4265 = vmatpush3.msra.mxu0 %v3934_v60 }
 0x694   :  { %4269 = vmatprep.subr.mxu0 %v4525_v12 }
 0x74c   :  { %v4238_v52 = vpop.f32.mrf.mxu0 }
 0x74d   :  { %v1841_v53 = vadd.f32 %v4238_v52, %v3926_v51 }
 0x74e   :  { %v1835_v54 = vpop.f32.mrf.mxu0 }
 0x74f   :  { %v1836_v55 = vadd.f32 %v3926_v51, %v1835_v54  ;;  %v1845_v13 = vmax.f32 %v1841_v53, 0.0 }
 0x751   :  { %v1844_v56 = vmax.f32 %v1836_v55, 0.0 }
 0x753   :  { %4255 = vmatprep.mubr.msk.f32.mxu1 %vm1861_vm8, %v1844_v56 }
 0x754   :  { %4256 = vmatmul.mubr.msk.f32.vlgmr.msra.gmra.mxu1 %vm1861_vm8, %v1845_v13 }
 0x755   :  { %4281 = vmatprep.mubr.msk.f32.mxu1 %vm4526_vm3, %v4525_v12 }
 0x814   :  { %v4257_v62 = vpop.f32.mrf.mxu1 }
 0x815   :  { %v1940_v63 = vadd.f32 %v4257_v62, %v3929_v61 }
 0x816   :  { %v1934_v0 = vpop.f32.mrf.mxu1 }
 0x817   :  { %v1944_v1 = vadd.f32 %v1940_v63, %v1751_v46  ;;  %v1935_v2 = vadd.f32 %v3929_v61, %v1934_v0 }
 0x819   :  { %v1943_v3 = vadd.f32 %v1935_v2, %v1750_v45  ;;  %v1946_v4 = vsel %vm148_vm2, %v1944_v1, 0.0 }
 0x81b   :  { %v1945_v5 = vsel %vm148_vm2, %v1943_v3, 0.0 }
 0x81c   :  { %v1947_v6 = vadd.f32 %v1946_v4, %v1945_v5 }
 0x81e   :  { %v1948_v7 = vrot.slane %v1947_v6, 4 }
 0x820   :  { %v1949_v8 = vadd.f32 %v1948_v7, %v1947_v6 }
 0x822   :  { %v1950_v9 = vrot.slane %v1949_v8, 2 }
 0x824   :  { %v1951_v15 = vadd.f32 %v1950_v9, %v1949_v8 }
 0x826   :  { %v1952_v16 = vrot.slane %v1951_v15, 1 }
 0x828   :  { %v1953_v17 = vadd.f32 %v1952_v16, %v1951_v15 }
 0x82a   :  { %v1954_v18 = vmul.f32 0.0625, %v1953_v17 }
 0x82c   :  { %v1955_v19 = vsub.f32 %v1943_v3, %v1954_v18  ;;  %v1956_v20 = vsub.f32 %v1944_v1, %v1954_v18 }
 0x82e   :  { %v1957_v21 = vmul.f32 %v1955_v19, %v1955_v19  ;;  %v1958_v22 = vmul.f32 %v1956_v20, %v1956_v20 }
 0x830   :  { %v1959_v23 = vsel %vm148_vm2, %v1957_v21, 0.0  ;;  %v1960_v24 = vsel %vm148_vm2, %v1958_v22, 0.0 }
 0x831   :  { %v1961_v25 = vadd.f32 %v1960_v24, %v1959_v23 }
 0x833   :  { %v1962_v27 = vrot.slane %v1961_v25, 4 }
 0x835   :  { %v1963_v28 = vadd.f32 %v1962_v27, %v1961_v25 }
 0x837   :  { %v1964_v29 = vrot.slane %v1963_v28, 2 }
 0x839   :  { %v1965_v30 = vadd.f32 %v1964_v29, %v1963_v28 }
 0x83b   :  { %v1966_v11 = vrot.slane %v1965_v30, 1 }
 0x83d   :  { %v1967_v10 = vadd.f32 %v1966_v11, %v1965_v30 }
 0x83f   :  { %v1968_v31 = vmul.f32 0.0625, %v1967_v10 }
 0x841   :  { %v1969_v32 = vadd.f32 1e-05, %v1968_v31 }
 0x843   :  { %4443 = vrsqrt.f32 %v1969_v32 }
 0x850   :  { %v4444_v33 = vpop.eup %4443 }
 0x851   :  { %v1971_v35 = vmul.f32 %v4444_v33, %v1955_v19  ;;  %v1972_v36 = vmul.f32 %v4444_v33, %v1956_v20 }
 0x853   :  { %v1980_v37 = vmul.f32 %v3932_v34, %v1971_v35  ;;  %v1981_v14 = vmul.f32 %v3932_v34, %v1972_v36 }
 0x855   :  { %v4933_v38 = vadd.f32 %v3933_v26, %v1980_v37  ;;  %v4935_v39 = vadd.f32 %v3933_v26, %v1981_v14 }
 0x857   :  { %4266 = vmatprep.mubr.msk.f32.mxu0 %vm148_vm2, %v4933_v38 }
 0x858   :  { %4267 = vmatmul.mubr.msk.f32.vlgmr.msra.gmra.mxu0 %vm148_vm2, %v4935_v39 }
 0x859   :  { %4271 = vmatprep.mubr.msk.f32.mxu0 %vm4526_vm3, %v4525_v12 }
 0x918   :  { %v4943_v41 = vpop.f32.mrf.mxu0 }
 0x91a   :  { %v4945_v42 = vpop.f32.mrf.mxu0 }
 0x91b   :  { %2248 = vrot.lane.b32.xlu1 %v4945_v42, %s4530_s29  ;;  %2078 = vrot.lane.b32.xlu0 %v4945_v42, %s4528_s27 }
 0x91f   :  { %2422 = vrot.lane.b32.xlu1 %v4945_v42, %s4529_s28  ;;  %2246 = vrot.lane.b32.xlu0 %v4945_v42, %s4527_s2 }
 0x923   :  { %2596 = vrot.lane.b32.xlu1 %v4945_v42, %s4531_s30  ;;  %2420 = vrot.lane.b32.xlu0 %v4945_v42, %s4532_s15 }
 0x927   :  { %2769 = vrot.lane.b32.xlu1 %v4943_v41, %s4528_s27  ;;  %2594 = vrot.lane.b32.xlu0 %v4945_v42, %s4533_s16  ;;  %s5236_s27 = smov 56  }
 0x92b   :  { %2937 = vrot.lane.b32.xlu1 %v4943_v41, %s4527_s2  ;;  %2939 = vrot.lane.b32.xlu0 %v4943_v41, %s4530_s29  ;;  %s5235_s2 = smov 48  }
 0x92f   :  { %3111 = vrot.lane.b32.xlu1 %v4943_v41, %s4532_s15  ;;  %3113 = vrot.lane.b32.xlu0 %v4943_v41, %s4529_s28  ;;  %s5237_s28 = smov 40  }
 0x933   :  { %3285 = vrot.lane.b32.xlu1 %v4943_v41, %s4533_s16  ;;  %3287 = vrot.lane.b32.xlu0 %v4943_v41, %s4531_s30 }
 0x937   :  { %2169 = vrot.lane.b32.xlu1 %v4945_v42, %s4534_s17 }
 0x98d   :  { %v2249_v43 = vpop.permute.xlu1 %2248  ;;  %v2079_v40 = vpop.permute.xlu0 %2078 }
 0x98e   :  { %4270 = vmatpush3.xpose.msk.msra.mxu0 %vm233_vm4, %v2079_v40  ;;  %4280 = vmatpush3.xpose.msk.msra.mxu1 %vm233_vm4, %v2249_v43 }
 0x98f   :  { %4289 = vmatprep.subr.mxu1 %v4525_v12  ;;  %4274 = vmatprep.subr.mxu0 %v4525_v12 }
 0x991   :  { %v2423_v44 = vpop.permute.xlu1 %2422  ;;  %4272 = vmatmul.mubr.msk.f32.vlgmr.msra.gmra.mxu0 %vm233_vm4, %v4945_v42  ;;  %v2247_v45 = vpop.permute.xlu0 %2246 }
 0x992   :  { %4282 = vmatmul.mubr.msk.f32.vlgmr.msra.gmra.mxu1 %vm233_vm4, %v2247_v45  ;;  %4276 = vmatprep.mubr.msk.f32.mxu0 %vm4526_vm3, %v4525_v12 }
 0x993   :  { %4290 = vmatpush3.xpose.msk.msra.mxu1 %vm233_vm4, %v2423_v44  ;;  %4291 = vmatprep.mubr.msk.f32.mxu1 %vm4526_vm3, %v4525_v12 }
 0x994   :  { %4299 = vmatprep.subr.mxu1 %v4525_v12 }
 0x995   :  { %v2597_v46 = vpop.permute.xlu1 %2596  ;;  %v2421_v47 = vpop.permute.xlu0 %2420 }
 0x996   :  { %4292 = vmatmul.mubr.msk.f32.vlgmr.msra.gmra.mxu1 %vm233_vm4, %v2421_v47 }
 0x997   :  { %4300 = vmatpush3.xpose.msk.msra.mxu1 %vm233_vm4, %v2597_v46  ;;  %4301 = vmatprep.mubr.msk.f32.mxu1 %vm4526_vm3, %v4525_v12 }
 0x998   :  { %4309 = vmatprep.subr.mxu1 %v4525_v12 }
 0x999   :  { %v2770_v48 = vpop.permute.xlu1 %2769  ;;  %v2595_v49 = vpop.permute.xlu0 %2594 }
 0x99a   :  { %4302 = vmatmul.mubr.msk.f32.vlgmr.msra.gmra.mxu1 %vm233_vm4, %v2595_v49 }
 0x99b   :  { %4310 = vmatpush3.xpose.msk.msra.mxu1 %vm233_vm4, %v2770_v48  ;;  %4311 = vmatprep.mubr.msk.f32.mxu1 %vm4526_vm3, %v4525_v12 }
 0x99c   :  { %4319 = vmatprep.subr.mxu1 %v4525_v12 }
 0x99d   :  { %v2938_v50 = vpop.permute.xlu1 %2937  ;;  %v2940_v51 = vpop.permute.xlu0 %2939 }
 0x99e   :  { %4312 = vmatmul.mubr.msk.f32.vlgmr.msra.gmra.mxu1 %vm233_vm4, %v4943_v41 }
 0x99f   :  { %4320 = vmatpush3.xpose.msk.msra.mxu1 %vm233_vm4, %v2940_v51  ;;  %4321 = vmatprep.mubr.msk.f32.mxu1 %vm4526_vm3, %v4525_v12 }
 0x9a0   :  { %4329 = vmatprep.subr.mxu1 %v4525_v12 }
 0x9a1   :  { %v3112_v52 = vpop.permute.xlu1 %3111  ;;  %v3114_v53 = vpop.permute.xlu0 %3113 }
 0x9a2   :  { %4322 = vmatmul.mubr.msk.f32.vlgmr.msra.gmra.mxu1 %vm233_vm4, %v2938_v50 }
 0x9a3   :  { %4330 = vmatpush3.xpose.msk.msra.mxu1 %vm233_vm4, %v3114_v53  ;;  %4331 = vmatprep.mubr.msk.f32.mxu1 %vm4526_vm3, %v4525_v12 }
 0x9a4   :  { %4339 = vmatprep.subr.mxu1 %v4525_v12 }
 0x9a5   :  { %v3286_v54 = vpop.permute.xlu1 %3285  ;;  %v3288_v55 = vpop.permute.xlu0 %3287 }
 0x9a6   :  { %4332 = vmatmul.mubr.msk.f32.vlgmr.msra.gmra.mxu1 %vm233_vm4, %v3112_v52 }
 0x9a7   :  { %4340 = vmatpush3.xpose.msk.msra.mxu1 %vm233_vm4, %v3288_v55  ;;  %4341 = vmatprep.mubr.msk.f32.mxu1 %vm4526_vm3, %v4525_v12 }
 0x9a9   :  { %v2170_v56 = vpop.permute.xlu1 %2169 }
 0x9aa   :  { %4275 = vmatpush3.msra.mxu0 %v2170_v56  ;;  %4342 = vmatmul.mubr.msk.f32.vlgmr.msra.gmra.mxu1 %vm233_vm4, %v3286_v54 }
 0x9ab   :  { %4284 = vmatprep.subr.mxu0 %v4525_v12 }
 0xa51   :  { %v2150_v13 = vpop.f32.mrf.mxu0 }
 0xa52   :  { %v2154_v57 = vmul.f32 0.35355338, %v2150_v13  ;;  %v2320_v58 = vpop.f32.mrf.mxu1 }
 0xa53   :  { %v2324_v59 = vmul.f32 0.35355338, %v2320_v58  ;;  %v4273_v60 = vpop.f32.mrf.mxu0 }
 0xa54   :  { %v4283_v61 = vpop.f32.mrf.mxu1  ;;  %v2155_v62 = vsel %vm233_vm4, %v2154_v57, -inf }
 0xa55   :  { %2156 = vmax.xlane.f32.xlu0 %v2155_v62  ;;  %v2325_v63 = vsel %vm233_vm4, %v2324_v59, -inf }
 0xa56   :  { %2326 = vmax.xlane.f32.xlu1 %v2325_v63  ;;  %v2494_v0 = vpop.f32.mrf.mxu1 }
 0xa57   :  { %v2498_v1 = vmul.f32 0.35355338, %v2494_v0 }
 0xa58   :  { %v4293_v2 = vpop.f32.mrf.mxu1 }
 0xa59   :  { %v2499_v3 = vsel %vm233_vm4, %v2498_v1, -inf }
 0xa5a   :  { %2500 = vmax.xlane.f32.xlu0 %v2499_v3  ;;  %v2668_v4 = vpop.f32.mrf.mxu1 }
 0xa5b   :  { %v2672_v5 = vmul.f32 0.35355338, %v2668_v4 }
 0xa5c   :  { %v4303_v6 = vpop.f32.mrf.mxu1 }
 0xa5d   :  { %v2673_v7 = vsel %vm233_vm4, %v2672_v5, -inf }
 0xa5e   :  { %2674 = vmax.xlane.f32.xlu0 %v2673_v7  ;;  %v2841_v8 = vpop.f32.mrf.mxu1 }
 0xa5f   :  { %v2845_v9 = vmul.f32 0.35355338, %v2841_v8 }
 0xa60   :  { %v4313_v15 = vpop.f32.mrf.mxu1 }
 0xa61   :  { %v2846_v16 = vsel %vm233_vm4, %v2845_v9, -inf }
 0xa62   :  { %2847 = vmax.xlane.f32.xlu1 %v2846_v16  ;;  %v3011_v17 = vpop.f32.mrf.mxu1 }
 0xa63   :  { %v3015_v18 = vmul.f32 0.35355338, %v3011_v17 }
 0xa64   :  { %v4323_v19 = vpop.f32.mrf.mxu1 }
 0xa65   :  { %v3016_v20 = vsel %vm233_vm4, %v3015_v18, -inf }
 0xa66   :  { %3017 = vmax.xlane.f32.xlu0 %v3016_v20  ;;  %v3185_v21 = vpop.f32.mrf.mxu1 }
 0xa67   :  { %v3189_v22 = vmul.f32 0.35355338, %v3185_v21 }
 0xa68   :  { %v4333_v23 = vpop.f32.mrf.mxu1 }
 0xa69   :  { %v3190_v24 = vsel %vm233_vm4, %v3189_v22, -inf }
 0xa6a   :  { %3191 = vmax.xlane.f32.xlu1 %v3190_v24  ;;  %v3359_v25 = vpop.f32.mrf.mxu1 }
 0xa6b   :  { %v3363_v27 = vmul.f32 0.35355338, %v3359_v25 }
 0xa6c   :  { %v4343_v28 = vpop.f32.mrf.mxu1 }
 0xa6d   :  { %v3364_v29 = vsel %vm233_vm4, %v3363_v27, -inf }
 0xa6e   :  { %3365 = vmax.xlane.f32.xlu0 %v3364_v29 }
 0xa7b   :  { %2513 = vrot.lane.b32.xlu1 %v4945_v42, %s5235_s2 }
 0xa84   :  { %2339 = vrot.lane.b32.xlu0 %v4945_v42, %s5236_s27 }
 0xade   :  { %v2157_v30 = vpop.xlane.xlu0 %2156 }
 0xadf   :  { %v2158_v11 = vsub.f32 %v2154_v57, %v2157_v30  ;;  %v2327_v10 = vpop.xlane.xlu1 %2326 }
 0xae0   :  { %v2328_v31 = vsub.f32 %v2324_v59, %v2327_v10 }
 0xae1   :  { %v2159_v32 = vmul.f32 1.442695, %v2158_v11 }
 0xae2   :  { %v2329_v33 = vmul.f32 1.442695, %v2328_v31 }
 0xae3   :  { %4445 = vpow2.f32 %v2159_v32  ;;  %v2501_v34 = vpop.xlane.xlu0 %2500 }
 0xae4   :  { %4447 = vpow2.f32 %v2329_v33  ;;  %v2502_v35 = vsub.f32 %v2498_v1, %v2501_v34 }
 0xae6   :  { %v2503_v36 = vmul.f32 1.442695, %v2502_v35 }
 0xae7   :  { %v2675_v26 = vpop.xlane.xlu0 %2674 }
 0xae8   :  { %4449 = vpow2.f32 %v2503_v36  ;;  %v2676_v37 = vsub.f32 %v2672_v5, %v2675_v26 }
 0xaea   :  { %v2677_v14 = vmul.f32 1.442695, %v2676_v37 }
 0xaeb   :  { %v2848_v55 = vpop.xlane.xlu1 %2847 }
 0xaec   :  { %4451 = vpow2.f32 %v2677_v14  ;;  %v2849_v56 = vsub.f32 %v2845_v9, %v2848_v55 }
 0xaee   :  { %v2850_v57 = vmul.f32 1.442695, %v2849_v56 }
 0xaef   :  { %v3018_v43 = vpop.xlane.xlu0 %3017 }
 0xaf0   :  { %v5029_v40 = vpop.eup %4445  ;;  %v3019_v44 = vsub.f32 %v3015_v18, %v3018_v43 }
 0xaf1   :  { %v5031_v45 = vpop.eup %4447  ;;  %v2161_v46 = vsel %vm233_vm4, %v5029_v40, 0.0 }
 0xaf2   :  { %v3020_v47 = vmul.f32 1.442695, %v3019_v44  ;;  %2162 = vadd.xlane.f32.xlu1 %v2161_v46  ;;  %v2331_v48 = vsel %vm233_vm4, %v5031_v45, 0.0 }
 0xaf3   :  { %2332 = vadd.xlane.f32.xlu0 %v2331_v48  ;;  %v3192_v13 = vpop.xlane.xlu1 %3191 }
 0xaf4   :  { %4453 = vpow2.f32 %v3020_v47  ;;  %v3193_v58 = vsub.f32 %v3189_v22, %v3192_v13 }
 0xaf5   :  { %v5037_v49 = vpop.eup %4449  ;;  %4455 = vpow2.f32 %v2850_v57 }
 0xaf6   :  { %v2505_v50 = vsel %vm233_vm4, %v5037_v49, 0.0  ;;  %v3194_v59 = vmul.f32 1.442695, %v3193_v58 }
 0xaf7   :  { %2506 = vadd.xlane.f32.xlu1 %v2505_v50  ;;  %v3366_v60 = vpop.xlane.xlu0 %3365  ;;  %v2514_v4 = vpop.permute.xlu1 %2513 }
 0xaf8   :  { %4457 = vpow2.f32 %v3194_v59  ;;  %v3367_v61 = vsub.f32 %v3363_v27, %v3366_v60 }
 0xaf9   :  { %v5041_v51 = vpop.eup %4451 }
 0xafa   :  { %v2679_v52 = vsel %vm233_vm4, %v5041_v51, 0.0  ;;  %v3368_v62 = vmul.f32 1.442695, %v3367_v61 }
 0xafb   :  { %2680 = vadd.xlane.f32.xlu0 %v2679_v52  ;;  %v2340_v5 = vpop.permute.xlu0 %2339 }
 0xafc   :  { %4459 = vpow2.f32 %v3368_v62 }
 0xb01   :  { %v5045_v53 = vpop.eup %4453 }
 0xb02   :  { %v3022_v54 = vsel %vm233_vm4, %v5045_v53, 0.0  ;;  %v5053_v63 = vpop.eup %4455 }
 0xb03   :  { %3023 = vadd.xlane.f32.xlu0 %v3022_v54 }
 0xb05   :  { %v5057_v0 = vpop.eup %4457 }
 0xb06   :  { %v3196_v1 = vsel %vm233_vm4, %v5057_v0, 0.0 }
 0xb08   :  { %2687 = vrot.lane.b32.xlu1 %v4945_v42, %s5237_s28  ;;  %v2852_v42 = vsel %vm233_vm4, %v5053_v63, 0.0 }
 0xb09   :  { %v5061_v2 = vpop.eup %4459 }
 0xb0a   :  { %v3370_v3 = vsel %vm233_vm4, %v5061_v2, 0.0 }
 0xb19   :  { %2860 = vrot.lane.b32.xlu0 %v4943_v41, %s4534_s17 }
 0xb2c   :  { %2853 = vadd.xlane.f32.xlu1 %v2852_v42 }
 0xb30   :  { %3197 = vadd.xlane.f32.xlu1 %v3196_v1 }
 0xb38   :  { %3371 = vadd.xlane.f32.xlu0 %v3370_v3 }
 0xb41   :  { %3030 = vrot.lane.b32.xlu1 %v4943_v41, %s5236_s27  ;;  %s4541_s27 = smov [#allocation3]  }
 0xb45   :  { %3378 = vrot.lane.b32.xlu1 %v4943_v41, %s5237_s28  ;;  %s3867_s28 = sshll.u32 %s4541_s27, 4  ;;  %s3868_s28 = int_to_ptr.vmem [resolvable:$true] %s3867_s28 }
 0xb46   :  { %p4486_p1 = scmp.lt.s32.totalorder %s3868_s28, %s3868_s28 }
 0xb4e   :  { %3204 = vrot.lane.b32.xlu0 %v4943_v41, %s5235_s2 }
 0xb7b   :  { %v2163_v6 = vpop.xlane.xlu1 %2162 }
 0xb7c   :  { %4461 = vrcp.f32 %v2163_v6  ;;  %v2333_v7 = vpop.xlane.xlu0 %2332 }
 0xb7d   :  { %4463 = vrcp.f32 %v2333_v7 }
 0xb80   :  { %v2507_v8 = vpop.xlane.xlu1 %2506 }
 0xb81   :  { %4465 = vrcp.f32 %v2507_v8 }
 0xb84   :  { %v2681_v9 = vpop.xlane.xlu0 %2680  ;;  %v2688_v33 = vpop.permute.xlu1 %2687 }
 0xb85   :  { %4467 = vrcp.f32 %v2681_v9 }
 0xb89   :  { %v4462_v15 = vpop.eup %4461 }
 0xb8a   :  { %v4464_v16 = vpop.eup %4463  ;;  %v2165_v17 = vmul.f32 %v4462_v15, %v2163_v6 }
 0xb8b   :  { %v2335_v18 = vmul.f32 %v4464_v16, %v2333_v7  ;;  %v3966_v7 = vld [vmem:[%s5218_s4 + $0x30] sm:$0xff] }
 0xb8c   :  { %v2166_v19 = vsub.f32 2.0, %v2165_v17  ;;  %v3024_v32 = vpop.xlane.xlu0 %3023 }
 0xb8d   :  { %v2336_v20 = vsub.f32 2.0, %v2335_v18  ;;  %4469 = vrcp.f32 %v3024_v32 }
 0xb8e   :  { %v4466_v21 = vpop.eup %4465  ;;  %v2167_v22 = vmul.f32 %v4462_v15, %v2166_v19 }
 0xb8f   :  { %v2509_v23 = vmul.f32 %v4466_v21, %v2507_v8  ;;  %v2337_v24 = vmul.f32 %v4464_v16, %v2336_v20  ;;  %v3964_v16 = vld [vmem:[%s5218_s4 + $0x20] sm:$0xff] }
 0xb90   :  { %v2168_v41 = vmul.f32 %v5029_v40, %v2167_v22  ;;  %v2861_v35 = vpop.permute.xlu0 %2860 }
 0xb91   :  { %v2510_v25 = vsub.f32 2.0, %v2509_v23  ;;  %v2338_v29 = vmul.f32 %v5031_v45, %v2337_v24 }
 0xb92   :  { %v4468_v27 = vpop.eup %4467  ;;  %4277 = vmatmul.mubr.msk.f32.vlgmr.msra.gmra.mxu0 %vm233_vm4, %v2168_v41 }
 0xb93   :  { %v2683_v28 = vmul.f32 %v4468_v27, %v2681_v9  ;;  %4285 = vmatpush3.msra.mxu0 %v2340_v5  ;;  %4286 = vmatprep.mubr.msk.f32.mxu0 %vm4526_vm3, %v4525_v12  ;;  %v2511_v30 = vmul.f32 %v4466_v21, %v2510_v25  ;;  %v3965_v9 = vld [vmem:[%s5218_s4 + $0x28] sm:$0xff] }
 0xb94   :  { %4294 = vmatprep.subr.mxu0 %v4525_v12 }
 0xb95   :  { %v2684_v11 = vsub.f32 2.0, %v2683_v28  ;;  %v2512_v10 = vmul.f32 %v5037_v49, %v2511_v30  ;;  %v3977_v30 = vld [vmem:[%s5221_s7 + $0x38] sm:$0xff] }
 0xb96   :  { %4287 = vmatmul.mubr.msk.f32.vlgmr.msra.gmra.mxu0 %vm233_vm4, %v2338_v29 }
 0xb97   :  { %4295 = vmatpush3.msra.mxu0 %v2514_v4  ;;  %4296 = vmatprep.mubr.msk.f32.mxu0 %vm4526_vm3, %v4525_v12  ;;  %v2685_v31 = vmul.f32 %v4468_v27, %v2684_v11  ;;  %v3976_v11 = vld [vmem:[%s5221_s7 + $0x30] sm:$0xff] }
 0xb98   :  { %4304 = vmatprep.subr.mxu0 %v4525_v12 }
 0xb99   :  { %v2686_v34 = vmul.f32 %v5041_v51, %v2685_v31  ;;  %v3974_v31 = vld [vmem:[%s5221_s7 + $0x20] sm:$0xff] }
 0xb9a   :  { %4297 = vmatmul.mubr.msk.f32.vlgmr.msra.gmra.mxu0 %vm233_vm4, %v2512_v10  ;;  %v4470_v37 = vpop.eup %4469  ;;  %v3975_v10 = vld [vmem:[%s5221_s7 + $0x28] sm:$0xff] }
 0xb9b   :  { %4305 = vmatpush3.msra.mxu0 %v2688_v33  ;;  %4306 = vmatprep.mubr.msk.f32.mxu0 %vm4526_vm3, %v4525_v12  ;;  %v3026_v43 = vmul.f32 %v4470_v37, %v3024_v32  ;;  %v3989_v32 = vld [vmem:[%s5223_s9 + $0x78] sm:$0xff]  ;;  %v3988_v33 = vld [vmem:[%s5223_s9 + $0x70] sm:$0xff] }
 0xb9c   :  { %4314 = vmatprep.subr.mxu0 %v4525_v12 }
 0xb9d   :  { %v3027_v45 = vsub.f32 2.0, %v3026_v43 }
 0xb9e   :  { %4307 = vmatmul.mubr.msk.f32.vlgmr.msra.gmra.mxu0 %vm233_vm4, %v2686_v34  ;;  %v3987_v34 = vld [vmem:[%s5223_s9 + $0x68] sm:$0xff] }
 0xb9f   :  { %4315 = vmatpush3.msra.mxu0 %v2861_v35  ;;  %4316 = vmatprep.mubr.msk.f32.mxu0 %vm4526_vm3, %v4525_v12  ;;  %v3028_v50 = vmul.f32 %v4470_v37, %v3027_v45  ;;  %v3986_v35 = vld [vmem:[%s5223_s9 + $0x60] sm:$0xff] }
 0xba0   :  { %4324 = vmatprep.subr.mxu0 %v4525_v12 }
 0xba1   :  { %v3029_v55 = vmul.f32 %v5045_v53, %v3028_v50 }
 0xbb5   :  { %v2854_v36 = vpop.xlane.xlu1 %2853 }
 0xbb6   :  { %4471 = vrcp.f32 %v2854_v36 }
 0xbb9   :  { %v3198_v26 = vpop.xlane.xlu1 %3197 }
 0xbba   :  { %4473 = vrcp.f32 %v3198_v26 }
 0xbbd   :  { %v3031_v54 = vpop.permute.xlu1 %3030 }
 0xbc1   :  { %v3372_v14 = vpop.xlane.xlu0 %3371  ;;  %v3379_v61 = vpop.permute.xlu1 %3378 }
 0xbc2   :  { %4475 = vrcp.f32 %v3372_v14 }
 0xbc3   :  { %v4472_v40 = vpop.eup %4471 }
 0xbc4   :  { %v2856_v44 = vmul.f32 %v4472_v40, %v2854_v36 }
 0xbc5   :  { %v3205_v58 = vpop.permute.xlu0 %3204 }
 0xbc6   :  { %v2857_v46 = vsub.f32 2.0, %v2856_v44 }
 0xbc7   :  { %v4474_v47 = vpop.eup %4473 }
 0xbc8   :  { %v2858_v48 = vmul.f32 %v4472_v40, %v2857_v46  ;;  %v3200_v49 = vmul.f32 %v4474_v47, %v3198_v26 }
 0xbca   :  { %v2859_v51 = vmul.f32 %v5053_v63, %v2858_v48  ;;  %v3201_v52 = vsub.f32 2.0, %v3200_v49 }
 0xbcc   :  { %4317 = vmatmul.mubr.msk.f32.vlgmr.msra.gmra.mxu0 %vm233_vm4, %v2859_v51  ;;  %v3202_v56 = vmul.f32 %v4474_v47, %v3201_v52 }
 0xbcd   :  { %4325 = vmatpush3.msra.mxu0 %v3031_v54  ;;  %4326 = vmatprep.mubr.msk.f32.mxu0 %vm4526_vm3, %v4525_v12 }
 0xbce   :  { %4334 = vmatprep.subr.mxu0 %v4525_v12  ;;  %v3203_v59 = vmul.f32 %v5057_v0, %v3202_v56 }
 0xbcf   :  { %v4476_v13 = vpop.eup %4475 }
 0xbd0   :  { %v3374_v57 = vmul.f32 %v4476_v13, %v3372_v14  ;;  %4327 = vmatmul.mubr.msk.f32.vlgmr.msra.gmra.mxu0 %vm233_vm4, %v3029_v55 }
 0xbd1   :  { %4335 = vmatpush3.msra.mxu0 %v3205_v58  ;;  %4336 = vmatprep.mubr.msk.f32.mxu0 %vm4526_vm3, %v4525_v12 }
 0xbd2   :  { %v3375_v60 = vsub.f32 2.0, %v3374_v57  ;;  %4344 = vmatprep.subr.mxu0 %v4525_v12 }
 0xbd4   :  { %v3376_v62 = vmul.f32 %v4476_v13, %v3375_v60  ;;  %4337 = vmatmul.mubr.msk.f32.vlgmr.msra.gmra.mxu0 %vm233_vm4, %v3203_v59 }
 0xbd5   :  { %4345 = vmatpush3.msra.mxu0 %v3379_v61  ;;  %4346 = vmatprep.mubr.msk.f32.mxu0 %vm4526_vm3, %v4525_v12 }
 0xbd6   :  { %v3377_v53 = vmul.f32 %v5061_v2, %v3376_v62  ;;  %v3967_v2 = vld [vmem:[%s5218_s4 + $0x38] sm:$0xff]  ;;  %4360 = vmatprep.subr.mxu0 %v3977_v30 }
 0xbd7   :  { %4349 = vmatprep.subr.mxu1 %v3967_v2 }
 0xbd8   :  { %4347 = vmatmul.mubr.msk.f32.vlgmr.msra.gmra.mxu0 %vm233_vm4, %v3377_v53  ;;  %4350 = vmatpush3.msra.mxu1 %v3967_v2 }
 0xbd9   :  { %4351 = vmatprep.subr.mxu1 %v3966_v7  ;;  %4361 = vmatpush3.msra.mxu0 %v3977_v30 }
 0xbda   :  { %4352 = vmatpush3.msra.mxu1 %v3966_v7  ;;  %4362 = vmatprep.subr.mxu0 %v3976_v11  ;;  %v3985_v7 = vld [vmem:[%s5223_s9 + $0x58] sm:$0xff] }
 0xbdb   :  { %4353 = vmatprep.subr.mxu1 %v3965_v9  ;;  %4363 = vmatpush3.msra.mxu0 %v3976_v11 }
 0xbdc   :  { %4354 = vmatpush3.msra.mxu1 %v3965_v9  ;;  %4364 = vmatprep.subr.mxu0 %v3975_v10  ;;  %v3983_v9 = vld [vmem:[%s5223_s9 + $0x48] sm:$0xff] }
 0xbdd   :  { %4355 = vmatprep.subr.mxu1 %v3964_v16  ;;  %4365 = vmatpush3.msra.mxu0 %v3975_v10 }
 0xbde   :  { %4356 = vmatpush3.msra.mxu1 %v3964_v16  ;;  %4366 = vmatprep.subr.mxu0 %v3974_v31  ;;  %v3979_v16 = vld [vmem:[%s5222_s8 + $0x1] ss:$0 sm:$0xff] }
 0xbdf   :  { %4367 = vmatpush3.msra.mxu0 %v3974_v31  ;;  %4371 = vmatprep.subr.mxu1 %v3989_v32 }
 0xc52   :  { %v2241_v63 = vpop.f32.mrf.mxu0 }
 0xc53   :  { %2245 = vst.msk [vmem:[#allocation2] sm:$0xff] %vm233_vm4, %v2241_v63 }
 0xc54   :  { %v4278_v42 = vpop.f32.mrf.mxu0 }
 0xc56   :  { %v2411_v0 = vpop.f32.mrf.mxu0 }
 0xc57   :  { %2416 = vrot.lane.b32.xlu0 %v2411_v0, %s4538_s1  ;;  %v3971_v0 = vld [vmem:[%s5219_s5 + $0x1] ss:$0 sm:$0xff] }
 0xc58   :  { %v4288_v1 = vpop.f32.mrf.mxu0 }
 0xc5a   :  { %v2585_v3 = vpop.f32.mrf.mxu0 }
 0xc5b   :  { %2590 = vrot.lane.b32.xlu1 %v2585_v3, %s4539_s21 }
 0xc5c   :  { %v4298_v4 = vpop.f32.mrf.mxu0 }
 0xc5d   :  { %v3973_v4 = vld [vmem:[%s5220_s6 + $0x1] ss:$0 sm:$0xff] }
 0xc5e   :  { %v2759_v5 = vpop.f32.mrf.mxu0 }
 0xc5f   :  { %2764 = vrot.lane.b32.xlu1 %v2759_v5, %s4540_s22 }
 0xc60   :  { %v4308_v12 = vpop.f32.mrf.mxu0 }
 0xc8c   :  { %v2932_v6 = vpop.f32.mrf.mxu0 }
 0xc8d   :  { %2936 = vst.msk [vmem:[#allocation2 + $0x8] sm:$0xff] %vm233_vm4, %v2932_v6 }
 0xc8e   :  { %v4318_v8 = vpop.f32.mrf.mxu0 }
 0xc8f   :  { %v3984_v8 = vld [vmem:[%s5223_s9 + $0x50] sm:$0xff] }
 0xc90   :  { %v3102_v15 = vpop.f32.mrf.mxu0 }
 0xc91   :  { %3107 = vrot.lane.b32.xlu0 %v3102_v15, %s4538_s1  ;;  %v3982_v15 = vld [vmem:[%s5223_s9 + $0x40] sm:$0xff] }
 0xc92   :  { %v4328_v17 = vpop.f32.mrf.mxu0 }
 0xc94   :  { %v3276_v18 = vpop.f32.mrf.mxu0 }
 0xc95   :  { %3281 = vrot.lane.b32.xlu0 %v3276_v18, %s4539_s21 }
 0xc96   :  { %v4338_v19 = vpop.f32.mrf.mxu0 }
 0xc98   :  { %v3450_v20 = vpop.f32.mrf.mxu0 }
 0xc99   :  { %3455 = vrot.lane.b32.xlu1 %v3450_v20, %s4540_s22 }
 0xc9a   :  { %v4348_v21 = vpop.f32.mrf.mxu0 }
 0xcc9   :  { %v2417_v22 = vpop.permute.xlu0 %2416 }
 0xcca   :  { %2419 = vst.msk [vmem:[#allocation2] sm:$0xff] %vm573_vm5, %v2417_v22 }
 0xccd   :  { %v2591_v23 = vpop.permute.xlu1 %2590 }
 0xcce   :  { %2593 = vst.msk [vmem:[#allocation2] sm:$0xff] %vm748_vm6, %v2591_v23  ;;  %v3991_v23 = vld [vmem:[%s5224_s10 + $0x1] ss:$0 sm:$0xff] }
 0xcd1   :  { %v2765_v41 = vpop.permute.xlu1 %2764 }
 0xcd2   :  { %2767 = vst.msk [vmem:[#allocation2] sm:$0xff] %vm923_vm7, %v2765_v41 }
 0xcd9   :  { %v3459_v24 = vld [vmem:[#allocation2] sm:$0xff] }
 0xcda   :  { %4357 = vmatprep.mubr.msk.f32.mxu1 %vm148_vm2, %v3459_v24 }
 0xd03   :  { %v3108_v25 = vpop.permute.xlu0 %3107 }
 0xd04   :  { %3110 = vst.msk [vmem:[#allocation2 + $0x8] sm:$0xff] %vm573_vm5, %v3108_v25 }
 0xd07   :  { %v3282_v27 = vpop.permute.xlu0 %3281 }
 0xd08   :  { %3284 = vst.msk [vmem:[#allocation2 + $0x8] sm:$0xff] %vm748_vm6, %v3282_v27 }
 0xd0b   :  { %v3456_v28 = vpop.permute.xlu1 %3455 }
 0xd0c   :  { %3458 = vst.msk [vmem:[#allocation2 + $0x8] sm:$0xff] %vm923_vm7, %v3456_v28 }
 0xd13   :  { %v3460_v29 = vld [vmem:[#allocation2 + $0x8] sm:$0xff] }
 0xd14   :  { %4358 = vmatmul.mubr.msk.f32.vlgmr.msra.gmra.mxu1 %vm148_vm2, %v3460_v29 }
 0xd15   :  { %4372 = vmatpush3.msra.mxu1 %v3989_v32 }
 0xd16   :  { %4373 = vmatprep.subr.mxu1 %v3988_v33 }
 0xd17   :  { %4374 = vmatpush3.msra.mxu1 %v3988_v33 }
 0xd18   :  { %4375 = vmatprep.subr.mxu1 %v3987_v34 }
 0xd19   :  { %4376 = vmatpush3.msra.mxu1 %v3987_v34 }
 0xd1a   :  { %4377 = vmatprep.subr.mxu1 %v3986_v35 }
 0xd1b   :  { %4378 = vmatpush3.msra.mxu1 %v3986_v35 }
 0xd1c   :  { %4379 = vmatprep.subr.mxu1 %v3985_v7 }
 0xd1d   :  { %4380 = vmatpush3.msra.mxu1 %v3985_v7 }
 0xd1e   :  { %4381 = vmatprep.subr.mxu1 %v3984_v8 }
 0xd1f   :  { %4382 = vmatpush3.msra.mxu1 %v3984_v8 }
 0xd20   :  { %4383 = vmatprep.subr.mxu1 %v3983_v9 }
 0xd21   :  { %4384 = vmatpush3.msra.mxu1 %v3983_v9 }
 0xd22   :  { %4385 = vmatprep.subr.mxu1 %v3982_v15 }
 0xd23   :  { %4386 = vmatpush3.msra.mxu1 %v3982_v15 }
 0xdd4   :  { %v4359_v36 = vpop.f32.mrf.mxu1 }
 0xdd5   :  { %v3548_v26 = vadd.f32 %v4359_v36, %v4935_v39 }
 0xdd6   :  { %v3538_v37 = vpop.f32.mrf.mxu1 }
 0xdd7   :  { %v3547_v14 = vadd.f32 %v3538_v37, %v4933_v38  ;;  %v3550_v43 = vsel %vm148_vm2, %v3548_v26, 0.0 }
 0xdd9   :  { %v3549_v40 = vsel %vm148_vm2, %v3547_v14, 0.0 }
 0xdda   :  { %v3551_v44 = vadd.f32 %v3550_v43, %v3549_v40 }
 0xddc   :  { %v3552_v45 = vrot.slane %v3551_v44, 4 }
 0xdde   :  { %v3553_v46 = vadd.f32 %v3552_v45, %v3551_v44 }
 0xde0   :  { %v3554_v47 = vrot.slane %v3553_v46, 2 }
 0xde2   :  { %v3555_v48 = vadd.f32 %v3554_v47, %v3553_v46 }
 0xde4   :  { %v3556_v49 = vrot.slane %v3555_v48, 1 }
 0xde6   :  { %v3557_v50 = vadd.f32 %v3556_v49, %v3555_v48 }
 0xde8   :  { %v3558_v51 = vmul.f32 0.0625, %v3557_v50 }
 0xdea   :  { %v3559_v52 = vsub.f32 %v3547_v14, %v3558_v51  ;;  %v3560_v54 = vsub.f32 %v3548_v26, %v3558_v51 }
 0xdec   :  { %v3561_v55 = vmul.f32 %v3559_v52, %v3559_v52  ;;  %v3562_v56 = vmul.f32 %v3560_v54, %v3560_v54 }
 0xdee   :  { %v3563_v39 = vsel %vm148_vm2, %v3561_v55, 0.0  ;;  %v3564_v38 = vsel %vm148_vm2, %v3562_v56, 0.0 }
 0xdef   :  { %v3565_v13 = vadd.f32 %v3564_v38, %v3563_v39  ;;  %v3995_v39 = vld [vmem:[%s5225_s11 + $0x1] ss:$0 sm:$0xff]  ;;  %s4481_s11 = scalar_lea.vmem %s3868_s28, 256 }
 0xdf0   :  { %p4482_p0 = scmp.ne.s32.totalorder %s3868_s28, %s4481_s11  ;;  %p4487_p2 = scmp.lt.s32.totalorder %s4481_s11, %s4481_s11 }
 0xdf1   :  { %v3566_v57 = vrot.slane %v3565_v13, 4 }
 0xdf2   :  { %p4488_p3 = por %p4487_p2, %p4486_p1 }
 0xdf3   :  { %v3567_v58 = vadd.f32 %v3566_v57, %v3565_v13  ;;  %v3997_v57 = vld [vmem:[%s5226_s12 + $0x1] ss:$0 sm:$0xff] }
 0xdf4   :  { %p4489_p4 = pnand %p4488_p3, %p4482_p0 }
 0xdf5   :  { %v3568_v59 = vrot.slane %v3567_v58, 2 }
 0xdf7   :  { %v3569_v60 = vadd.f32 %v3568_v59, %v3567_v58 }
 0xdf9   :  { %v3570_v61 = vrot.slane %v3569_v60, 1 }
 0xdfb   :  { %v3571_v62 = vadd.f32 %v3570_v61, %v3569_v60 }
 0xdfd   :  { %v3572_v53 = vmul.f32 0.0625, %v3571_v62 }
 0xdff   :  { %v3573_v63 = vadd.f32 1e-05, %v3572_v53 }
 0xe01   :  { %4477 = vrsqrt.f32 %v3573_v63 }
 0xe0e   :  { %v4478_v42 = vpop.eup %4477 }
 0xe0f   :  { %v3575_v1 = vmul.f32 %v4478_v42, %v3559_v52  ;;  %v3576_v3 = vmul.f32 %v4478_v42, %v3560_v54 }
 0xe11   :  { %v3585_v5 = vmul.f32 %v3971_v0, %v3575_v1  ;;  %v3586_v12 = vmul.f32 %v3971_v0, %v3576_v3 }
 0xe13   :  { %v3595_v6 = vadd.f32 %v3973_v4, %v3585_v5  ;;  %v3596_v2 = vadd.f32 %v3973_v4, %v3586_v12 }
 0xe15   :  { %4368 = vmatprep.mubr.msk.f32.mxu0 %vm148_vm2, %v3595_v6 }
 0xe16   :  { %4369 = vmatmul.mubr.msk.f32.vlgmr.msra.gmra.mxu0 %vm148_vm2, %v3596_v2 }
 0xed6   :  { %v4370_v17 = vpop.f32.mrf.mxu0 }
 0xed7   :  { %v3688_v18 = vadd.f32 %v4370_v17, %v3979_v16 }
 0xed8   :  { %v3682_v19 = vpop.f32.mrf.mxu0 }
 0xed9   :  { %v3683_v20 = vadd.f32 %v3979_v16, %v3682_v19  ;;  %v3692_v22 = vmax.f32 %v3688_v18, 0.0 }
 0xedb   :  { %v3691_v21 = vmax.f32 %v3683_v20, 0.0 }
 0xedd   :  { %4387 = vmatprep.mubr.msk.f32.mxu1 %vm1861_vm8, %v3691_v21 }
 0xede   :  { %4388 = vmatmul.mubr.msk.f32.vlgmr.msra.gmra.mxu1 %vm1861_vm8, %v3692_v22 }
 0xf9e   :  { %v4389_v41 = vpop.f32.mrf.mxu1 }
 0xf9f   :  { %v3788_v24 = vadd.f32 %v4389_v41, %v3991_v23 }
 0xfa0   :  { %v3782_v25 = vpop.f32.mrf.mxu1 }
 0xfa1   :  { %v3792_v27 = vadd.f32 %v3788_v24, %v3596_v2  ;;  %v3783_v28 = vadd.f32 %v3991_v23, %v3782_v25 }
 0xfa3   :  { %v3791_v29 = vadd.f32 %v3783_v28, %v3595_v6  ;;  %v3794_v30 = vsel %vm148_vm2, %v3792_v27, 0.0 }
 0xfa5   :  { %v3793_v11 = vsel %vm148_vm2, %v3791_v29, 0.0 }
 0xfa6   :  { %v3795_v10 = vadd.f32 %v3794_v30, %v3793_v11 }
 0xfa8   :  { %v3796_v31 = vrot.slane %v3795_v10, 4 }
 0xfaa   :  { %v3797_v32 = vadd.f32 %v3796_v31, %v3795_v10 }
 0xfac   :  { %v3798_v33 = vrot.slane %v3797_v32, 2 }
 0xfae   :  { %v3799_v34 = vadd.f32 %v3798_v33, %v3797_v32 }
 0xfb0   :  { %v3800_v35 = vrot.slane %v3799_v34, 1 }
 0xfb2   :  { %v3801_v36 = vadd.f32 %v3800_v35, %v3799_v34 }
 0xfb4   :  { %v3802_v26 = vmul.f32 0.0625, %v3801_v36 }
 0xfb6   :  { %v3803_v37 = vsub.f32 %v3791_v29, %v3802_v26  ;;  %v3804_v14 = vsub.f32 %v3792_v27, %v3802_v26 }
 0xfb8   :  { %v3805_v43 = vmul.f32 %v3803_v37, %v3803_v37  ;;  %v3806_v40 = vmul.f32 %v3804_v14, %v3804_v14 }
 0xfba   :  { %v3807_v44 = vsel %vm148_vm2, %v3805_v43, 0.0  ;;  %v3808_v45 = vsel %vm148_vm2, %v3806_v40, 0.0 }
 0xfbb   :  { %v3809_v46 = vadd.f32 %v3808_v45, %v3807_v44 }
 0xfbd   :  { %v3810_v47 = vrot.slane %v3809_v46, 4 }
 0xfbf   :  { %v3811_v48 = vadd.f32 %v3810_v47, %v3809_v46 }
 0xfc1   :  { %v3812_v49 = vrot.slane %v3811_v48, 2 }
 0xfc3   :  { %v3813_v50 = vadd.f32 %v3812_v49, %v3811_v48 }
 0xfc5   :  { %v3814_v51 = vrot.slane %v3813_v50, 1 }
 0xfc7   :  { %v3815_v52 = vadd.f32 %v3814_v51, %v3813_v50 }
 0xfc9   :  { %v3816_v54 = vmul.f32 0.0625, %v3815_v52 }
 0xfcb   :  { %v3817_v55 = vadd.f32 1e-05, %v3816_v54 }
 0xfcd   :  { %4479 = vrsqrt.f32 %v3817_v55 }
 0xfda   :  { %v4480_v56 = vpop.eup %4479 }
 0xfdb   :  { %v3819_v38 = vmul.f32 %v4480_v56, %v3803_v37  ;;  %v3820_v13 = vmul.f32 %v4480_v56, %v3804_v14 }
 0xfdd   :  { %v3829_v58 = vmul.f32 %v3995_v39, %v3819_v38  ;;  %v3830_v59 = vmul.f32 %v3995_v39, %v3820_v13 }
 0xfdf   :  { %v3839_v60 = vadd.f32 %v3997_v57, %v3829_v58  ;;  %v3840_v61 = vadd.f32 %v3997_v57, %v3830_v59 }
 0xfe1   :  { %3841 = vst.msk [vmem:[#allocation3] sm:$0xff] %vm148_vm2, %v3839_v60  ;;  %3842 = vst.msk [vmem:[#allocation3 + $0x8] sm:$0xff] %vm148_vm2, %v3840_v61  ;;  %v3843_v62 = vsel %vm148_vm2, %v3839_v60, 0.0  ;;  %v3853_v53 = vsel %vm148_vm2, %v3840_v61, 0.0 }
 0xfe2   :  { %v3844_v63 = vrot.slane %v3843_v62, 4  ;;  %v3854_v42 = vrot.slane %v3853_v53, 4 }
 0xfe3   :  { %4492 = shalt.err (!%p4489_p4)
}
 0xfe4   :  { %s4542_s12 = smov 128   ;;  %v3845_v0 = vadd.f32 %v3844_v63, %v3843_v62  ;;  %v3855_v1 = vadd.f32 %v3854_v42, %v3853_v53  ;;  %s4543_s7 = smov [#allocation5]   ;;  %vm3851_vm9 = vcmask 253952  }
 0xfe5   :  { %3873 = dma.vmem_to_hbm [thread:$0]  %s3868_s28, 256, %s5227_s13, [#allocation4], %s4542_s12, %s4542_s12, %s4538_s1  }
 0xfe6   :  { %v3846_v3 = vrot.slane %v3845_v0, 2  ;;  %v3856_v4 = vrot.slane %v3855_v1, 2  ;;  %s3880_s15 = sshll.u32 %s4543_s7, 4  ;;  %s3881_s15 = int_to_ptr.vmem [resolvable:$true] %s3880_s15 }
 0xfe7   :  { %s4501_s16 = scalar_lea.vmem %s3881_s15, 32  ;;  %p4506_p6 = scmp.lt.s32.totalorder %s3881_s15, %s3881_s15 }
 0xfe8   :  { %v3847_v5 = vadd.f32 %v3846_v3, %v3845_v0  ;;  %v3857_v12 = vadd.f32 %v3856_v4, %v3855_v1  ;;  %p4502_p5 = scmp.ne.s32.totalorder %s3881_s15, %s4501_s16  ;;  %p4507_p7 = scmp.lt.s32.totalorder %s4501_s16, %s4501_s16 }
 0xfea   :  { %v3848_v6 = vrot.slane %v3847_v5, 1  ;;  %v3858_v2 = vrot.slane %v3857_v12, 1  ;;  %p4508_p8 = por %p4507_p7, %p4506_p6 }
 0xfec   :  { %v3849_v7 = vadd.f32 %v3848_v6, %v3847_v5  ;;  %v3859_v8 = vadd.f32 %v3858_v2, %v3857_v12  ;;  %p4509_p9 = pnand %p4508_p8, %p4502_p5 }
 0xfee   :  { %v3850_v9 = vmul.f32 0.125, %v3849_v7  ;;  %v3860_v15 = vmul.f32 0.125, %v3859_v8 }
 0xff0   :  { %3852 = vst.msk [vmem:[#allocation5] sm:$0x1] %vm3851_vm9, %v3850_v9  ;;  %3861 = vst.msk [vmem:[#allocation5 + $0x1] sm:$0x1] %vm3851_vm9, %v3860_v15 }
 0xff1   :  { %4512 = shalt.err (!%p4509_p9)
}
 0xff2   :  { %3883 = dma.vmem_to_hbm [thread:$0]  %s3881_s15, 32, %s5228_s14, [#allocation6]  }
 0xff3   :  { %4521 = dma.done.wait [#allocation4], 256  }
 0xff4   :  { %4522 = vsyncadd [#allocation4], 4294967040 }
 0xff5   :  { %4523 = dma.done.wait [#allocation6], 32  }
 0xff6   :  { %4524 = vsyncadd [#allocation6], 4294967264 }
 0xff7   :  { %3890 = vsyncpa [#allocation4], 1 }
 0xff8   :  { %3891 = vsyncpa [#allocation6], 1 }

</bundles_post_ra>
